<compile_context>
chip_gen: v7x
topology: tpu7x:2x2x1
jax: 0.10.0
libtpu: 0.0.40
codegen_flags: <defaults>
</compile_context>

<pallas_src>
import functools
import math

import jax
import jax.numpy as jnp
from jax.experimental import pallas as pl
from jax.experimental.pallas import tpu as pltpu


# ----------------------------- Pallas kernels -----------------------------

def _conv_act_kernel(x_ref, w_ref, b_ref, o_ref, *, neg_slope):
    """One M-tile of: im2col matmul (bf16 x bf16 -> f32) + bias (+ LeakyReLU)."""
    acc = jnp.dot(x_ref[...], w_ref[...], preferred_element_type=jnp.float32)
    acc = acc + b_ref[...]
    if neg_slope is not None:
        acc = jnp.where(acc >= 0, acc, neg_slope * acc)
    o_ref[...] = acc.astype(o_ref.dtype)


def _conv_bn_act_kernel(x_ref, w_ref, b_ref, o_ref, *, neg_slope, eps, inv_m):
    """Fully fused conv matmul + bias + training-mode BatchNorm + LeakyReLU.

    The whole (M, Cout) activation stays resident: the matmul epilogue computes
    per-channel batch statistics (two-pass variance to avoid E[x^2]-E[x]^2
    cancellation), normalization uses rsqrt (EUP slot), and LeakyReLU is
    applied before the single store.  Elementwise math is f32; only the MXU
    operands are bf16.
    """
    acc = jnp.dot(x_ref[...], w_ref[...], preferred_element_type=jnp.float32)
    acc = acc + b_ref[...]
    mean = jnp.sum(acc, axis=0, keepdims=True) * inv_m
    centered = acc - mean
    var = jnp.sum(centered * centered, axis=0, keepdims=True) * inv_m
    y = centered * jax.lax.rsqrt(var + eps)            # gamma = 1, beta = 0
    if neg_slope is not None:
        y = jnp.where(y >= 0, y, neg_slope * y)
    o_ref[...] = y.astype(o_ref.dtype)


# ----------------------------- Pallas wrappers -----------------------------

def conv_act_pallas(cols, w_mat, b, *, neg_slope, out_dtype, block_m=256):
    """Conv (no BN): grid over M rows, 'parallel' so v7x can use both TCs."""
    M, K = cols.shape
    _, C = w_mat.shape
    tm = block_m if (M % block_m == 0) else M          # exact tiles at these sizes
    kernel = functools.partial(_conv_act_kernel, neg_slope=neg_slope)
    return pl.pallas_call(
        kernel,
        out_shape=jax.ShapeDtypeStruct((M, C), out_dtype),
        grid=(M // tm,),
        in_specs=[
            pl.BlockSpec((tm, K), lambda i: (i, 0)),
            pl.BlockSpec((K, C), lambda i: (0, 0)),
            pl.BlockSpec((1, C), lambda i: (0, 0)),
        ],
        # NOTE: Cout (8 / 1 here with ndf=8) is < 128 lanes, so stores are
        # masked; padding channels to 128 would inflate the next layer's K by
        # 16x for these toy shapes, so it is intentionally not done here.
        out_specs=pl.BlockSpec((tm, C), lambda i: (i, 0)),
        compiler_params=pltpu.CompilerParams(
            dimension_semantics=("parallel",)),
    )(cols, w_mat, b.reshape(1, C).astype(jnp.float32))


def conv_bn_act_pallas(cols, w_mat, b, *, neg_slope, eps, out_dtype):
    """Fused conv + BatchNorm + LeakyReLU; single block (needs full-batch stats)."""
    M, K = cols.shape
    _, C = w_mat.shape
    kernel = functools.partial(_conv_bn_act_kernel, neg_slope=neg_slope,
                               eps=eps, inv_m=1.0 / M)
    return pl.pallas_call(
        kernel,
        out_shape=jax.ShapeDtypeStruct((M, C), out_dtype),
        grid=(1,),
        in_specs=[
            pl.BlockSpec((M, K), lambda i: (0, 0)),
            pl.BlockSpec((K, C), lambda i: (0, 0)),
            pl.BlockSpec((1, C), lambda i: (0, 0)),
        ],
        out_specs=pl.BlockSpec((M, C), lambda i: (0, 0)),
        compiler_params=pltpu.CompilerParams(
            dimension_semantics=("arbitrary",)),
    )(cols, w_mat, b.reshape(1, C).astype(jnp.float32))


# ------------------------------- JAX glue ----------------------------------

def im2col(x, k, stride, pad):
    """Patch extraction in plain JAX (NHWC -> (N*Ho*Wo, k*k*C)), kept in bf16."""
    N, H, W, C = x.shape
    xp = jnp.pad(x, ((0, 0), (pad, pad), (pad, pad), (0, 0)))
    Ho = (H + 2 * pad - k) // stride + 1
    Wo = (W + 2 * pad - k) // stride + 1
    cols = []
    for kh in range(k):
        for kw in range(k):
            cols.append(xp[:, kh:kh + stride * Ho:stride,
                           kw:kw + stride * Wo:stride, :])
    patches = jnp.concatenate(cols, axis=-1)             # (N, Ho, Wo, k*k*C)
    return patches.reshape(N * Ho * Wo, k * k * C), (N, Ho, Wo)


def conv_layer(x, w, b, *, stride, act, bn, k=4, pad=1, neg_slope=0.2, eps=1e-5,
               out_dtype=jnp.bfloat16):
    # x: NHWC bf16, w: (Cout, Cin, kh, kw) f32 (PyTorch layout), b: (Cout,) f32
    cols, (N, Ho, Wo) = im2col(x, k, stride, pad)
    cout, cin = w.shape[0], w.shape[1]
    w_mat = jnp.transpose(w, (2, 3, 1, 0)).reshape(k * k * cin, cout)
    w_mat = w_mat.astype(jnp.bfloat16)
    if bn:
        y = conv_bn_act_pallas(cols, w_mat, b,
                               neg_slope=(neg_slope if act else None),
                               eps=eps, out_dtype=out_dtype)
    else:
        y = conv_act_pallas(cols, w_mat, b,
                            neg_slope=(neg_slope if act else None),
                            out_dtype=out_dtype)
    return y.reshape(N, Ho, Wo, cout)


def patchgan_forward(params, input_image, target_image):
    # PyTorch-facing I/O is NCHW; internally NHWC with bf16 MXU operands.
    x = jnp.concatenate([input_image, target_image], axis=1)      # (N, 2*Cin, H, W)
    x = jnp.transpose(x, (0, 2, 3, 1)).astype(jnp.bfloat16)       # NHWC
    x = conv_layer(x, params["w1"], params["b1"], stride=2, act=True, bn=False)
    x = conv_layer(x, params["w2"], params["b2"], stride=2, act=True, bn=True)
    x = conv_layer(x, params["w3"], params["b3"], stride=2, act=True, bn=True)
    x = conv_layer(x, params["w4"], params["b4"], stride=1, act=True, bn=True)
    x = conv_layer(x, params["w5"], params["b5"], stride=1, act=False, bn=False,
                   out_dtype=jnp.float32)
    return jnp.transpose(x, (0, 3, 1, 2)).astype(jnp.float32)     # NCHW


def init_params(key, in_channels=3, ndf=8):
    layer_io = [
        (in_channels * 2, ndf),
        (ndf, ndf * 2),
        (ndf * 2, ndf * 4),
        (ndf * 4, ndf * 8),
        (ndf * 8, 1),
    ]
    params = {}
    for i, (cin, cout) in enumerate(layer_io, start=1):
        key, kw, kb = jax.random.split(key, 3)
        bound = 1.0 / math.sqrt(cin * 4 * 4)   # PyTorch default conv init range
        params[f"w{i}"] = jax.random.uniform(
            kw, (cout, cin, 4, 4), jnp.float32, -bound, bound)
        params[f"b{i}"] = jax.random.uniform(
            kb, (cout,), jnp.float32, -bound, bound)
    return params


# -------------------------- pure-JAX reference -----------------------------

def reference_forward(params, input_image, target_image, eps=1e-5):
    """Matching-precision reference: bf16 conv operands, f32 accumulation,
    f32 BatchNorm/LeakyReLU, bf16 activation hand-off between layers."""
    x = jnp.concatenate([input_image, target_image], axis=1).astype(jnp.float32)

    def conv(v, w, b, stride):
        y = jax.lax.conv_general_dilated(
            v.astype(jnp.bfloat16), w.astype(jnp.bfloat16),
            (stride, stride), [(1, 1), (1, 1)],
            dimension_numbers=("NCHW", "OIHW", "NCHW"),
            preferred_element_type=jnp.float32)
        return y + b.reshape(1, -1, 1, 1)

    def bn(v):
        mean = jnp.mean(v, axis=(0, 2, 3), keepdims=True)
        var = jnp.mean((v - mean) ** 2, axis=(0, 2, 3), keepdims=True)
        return (v - mean) * jax.lax.rsqrt(var + eps)

    lrelu = lambda v: jnp.where(v >= 0, v, 0.2 * v)
    hand_off = lambda v: v.astype(jnp.bfloat16).astype(jnp.float32)

    x = hand_off(lrelu(conv(x, params["w1"], params["b1"], 2)))
    x = hand_off(lrelu(bn(conv(x, params["w2"], params["b2"], 2))))
    x = hand_off(lrelu(bn(conv(x, params["w3"], params["b3"], 2))))
    x = hand_off(lrelu(bn(conv(x, params["w4"], params["b4"], 1))))
    x = conv(x, params["w5"], params["b5"], 1)
    return x


# --------------------------------- main -------------------------------------

if __name__ == "__main__":
    key = jax.random.PRNGKey(0)
    k_in, k_tgt, k_par = jax.random.split(key, 3)

    N, C, H, W = 2, 3, 32, 32          # small shapes; 32x32 keeps all 5 convs valid
    ndf = 8
    input_image = jax.random.normal(k_in, (N, C, H, W), jnp.float32)
    target_image = jax.random.normal(k_tgt, (N, C, H, W), jnp.float32)
    params = init_params(k_par, in_channels=C, ndf=ndf)

    fwd = jax.jit(patchgan_forward)
    out = jax.block_until_ready(fwd(params, input_image, target_image))
    ref = jax.block_until_ready(reference_forward(params, input_image, target_image))

    assert out.shape == ref.shape == (N, 1, 2, 2), out.shape
    max_err = float(jnp.max(jnp.abs(out - ref)))
    assert jnp.allclose(out, ref, rtol=1e-2, atol=1e-2), max_err

    print("KERNEL_OK")
</pallas_src>

<mosaic_0001>
module attributes {stable_mosaic.version = 11 : i64} {
  func.func @_conv_act_kernel(%arg0: i32, %arg1: memref<256x96xbf16, #tpu.memory_space<vmem>>, %arg2: memref<96x8xbf16, #tpu.memory_space<vmem>>, %arg3: memref<1x8xf32, #tpu.memory_space<vmem>>, %arg4: memref<256x8xbf16, #tpu.memory_space<vmem>>) attributes {dimension_semantics = [#tpu.dimension_semantics<parallel>], iteration_bounds = array<i64: 2>, scalar_prefetch = 0 : i64, scratch_operands = 0 : i64, tpu.core_type = #tpu.core_type<tc>, window_params = [{transform_indices = @transform_0, window_bounds = array<i64: 256, 96>}, {pipeline_mode = #tpu.pipeline_mode<synchronous>, transform_indices = @transform_1, window_bounds = array<i64: 96, 8>}, {pipeline_mode = #tpu.pipeline_mode<synchronous>, transform_indices = @transform_2, window_bounds = array<i64: 1, 8>}, {transform_indices = @transform_3, window_bounds = array<i64: 256, 8>}]} {
    %c0 = arith.constant 0 : index
    %c0_0 = arith.constant 0 : index
    %0 = vector.load %arg1[%c0, %c0_0] : memref<256x96xbf16, #tpu.memory_space<vmem>>, vector<256x96xbf16>
    %c0_1 = arith.constant 0 : index
    %c0_2 = arith.constant 0 : index
    %1 = vector.load %arg2[%c0_1, %c0_2] : memref<96x8xbf16, #tpu.memory_space<vmem>>, vector<96x8xbf16>
    %cst = arith.constant dense<0.000000e+00> : vector<256x8xf32>
    %2 = tpu.matmul %0, %1, %cst {dimension_numbers = #tpu.dot_dimension_numbers<[1], [0], [0], [1], [0, 0, 1, 1], [], []>} : vector<256x96xbf16>, vector<96x8xbf16>, vector<256x8xf32> -> vector<256x8xf32>
    %c0_3 = arith.constant 0 : index
    %c0_4 = arith.constant 0 : index
    %3 = vector.load %arg3[%c0_3, %c0_4] : memref<1x8xf32, #tpu.memory_space<vmem>>, vector<1x8xf32>
    %4 = vector.broadcast %3 : vector<1x8xf32> to vector<256x8xf32>
    %5 = arith.addf %2, %4 : vector<256x8xf32>
    %cst_5 = arith.constant 0.000000e+00 : f32
    %6 = vector.broadcast %cst_5 : f32 to vector<256x8xf32>
    %7 = arith.cmpf oge, %5, %6 : vector<256x8xf32>
    %cst_6 = arith.constant 2.000000e-01 : f32
    %8 = vector.broadcast %cst_6 : f32 to vector<256x8xf32>
    %9 = arith.mulf %8, %5 : vector<256x8xf32>
    %10 = arith.select %7, %5, %9 : vector<256x8xi1>, vector<256x8xf32>
    %11 = arith.truncf %10 : vector<256x8xf32> to vector<256x8xbf16>
    %c0_7 = arith.constant 0 : index
    %c0_8 = arith.constant 0 : index
    %12 = vector.load %arg4[%c0_7, %c0_8] : memref<256x8xbf16, #tpu.memory_space<vmem>>, vector<256x8xbf16>
    tpu.vector_store %arg4[%c0_7, %c0_8], %11 {strides = array<i32>} : memref<256x8xbf16, #tpu.memory_space<vmem>>, vector<256x8xbf16>,
    return
  }
  func.func @transform_0(%arg0: i32) -> (i32, i32) {
    %c0_i32 = arith.constant 0 : i32
    %c0_i32_0 = arith.constant 0 : i32
    return %arg0, %c0_i32 : i32, i32
  }
  func.func @transform_1(%arg0: i32) -> (i32, i32) {
    %c0_i32 = arith.constant 0 : i32
    %c0_i32_0 = arith.constant 0 : i32
    %c0_i32_1 = arith.constant 0 : i32
    return %c0_i32, %c0_i32_0 : i32, i32
  }
  func.func @transform_2(%arg0: i32) -> (i32, i32) {
    %c0_i32 = arith.constant 0 : i32
    %c0_i32_0 = arith.constant 0 : i32
    %c0_i32_1 = arith.constant 0 : i32
    return %c0_i32, %c0_i32_0 : i32, i32
  }
  func.func @transform_3(%arg0: i32) -> (i32, i32) {
    %c0_i32 = arith.constant 0 : i32
    %c0_i32_0 = arith.constant 0 : i32
    return %arg0, %c0_i32 : i32, i32
  }
}

module attributes {stable_mosaic.version = 11 : i64} {
  func.func @_conv_bn_act_kernel(%arg0: i32, %arg1: memref<128x128xbf16, #tpu.memory_space<vmem>>, %arg2: memref<128x16xbf16, #tpu.memory_space<vmem>>, %arg3: memref<1x16xf32, #tpu.memory_space<vmem>>, %arg4: memref<128x16xbf16, #tpu.memory_space<vmem>>) attributes {dimension_semantics = [#tpu.dimension_semantics<arbitrary>], iteration_bounds = array<i64: 1>, scalar_prefetch = 0 : i64, scratch_operands = 0 : i64, tpu.core_type = #tpu.core_type<tc>, window_params = [{pipeline_mode = #tpu.pipeline_mode<synchronous>, transform_indices = @transform_0, window_bounds = array<i64: 128, 128>}, {pipeline_mode = #tpu.pipeline_mode<synchronous>, transform_indices = @transform_1, window_bounds = array<i64: 128, 16>}, {pipeline_mode = #tpu.pipeline_mode<synchronous>, transform_indices = @transform_2, window_bounds = array<i64: 1, 16>}, {pipeline_mode = #tpu.pipeline_mode<synchronous>, transform_indices = @transform_3, window_bounds = array<i64: 128, 16>}]} {
    %c0 = arith.constant 0 : index
    %c0_0 = arith.constant 0 : index
    %0 = vector.load %arg1[%c0, %c0_0] : memref<128x128xbf16, #tpu.memory_space<vmem>>, vector<128x128xbf16>
    %c0_1 = arith.constant 0 : index
    %c0_2 = arith.constant 0 : index
    %1 = vector.load %arg2[%c0_1, %c0_2] : memref<128x16xbf16, #tpu.memory_space<vmem>>, vector<128x16xbf16>
    %cst = arith.constant dense<0.000000e+00> : vector<128x16xf32>
    %2 = tpu.matmul %0, %1, %cst {dimension_numbers = #tpu.dot_dimension_numbers<[1], [0], [0], [1], [0, 0, 1, 1], [], []>} : vector<128x128xbf16>, vector<128x16xbf16>, vector<128x16xf32> -> vector<128x16xf32>
    %c0_3 = arith.constant 0 : index
    %c0_4 = arith.constant 0 : index
    %3 = vector.load %arg3[%c0_3, %c0_4] : memref<1x16xf32, #tpu.memory_space<vmem>>, vector<1x16xf32>
    %4 = vector.broadcast %3 : vector<1x16xf32> to vector<128x16xf32>
    %5 = arith.addf %2, %4 : vector<128x16xf32>
    %cst_5 = arith.constant dense<0.000000e+00> : vector<16xf32>
    %6 = vector.multi_reduction <add>, %5, %cst_5 [0] : vector<128x16xf32> to vector<16xf32>
    %7 = vector.shape_cast %6 : vector<16xf32> to vector<1x16xf32>
    %cst_6 = arith.constant 7.812500e-03 : f32
    %8 = vector.broadcast %cst_6 : f32 to vector<1x16xf32>
    %9 = arith.mulf %7, %8 : vector<1x16xf32>
    %10 = vector.broadcast %9 : vector<1x16xf32> to vector<128x16xf32>
    %11 = arith.subf %5, %10 : vector<128x16xf32>
    %12 = arith.mulf %11, %11 : vector<128x16xf32>
    %cst_7 = arith.constant dense<0.000000e+00> : vector<16xf32>
    %13 = vector.multi_reduction <add>, %12, %cst_7 [0] : vector<128x16xf32> to vector<16xf32>
    %14 = vector.shape_cast %13 : vector<16xf32> to vector<1x16xf32>
    %cst_8 = arith.constant 7.812500e-03 : f32
    %15 = vector.broadcast %cst_8 : f32 to vector<1x16xf32>
    %16 = arith.mulf %14, %15 : vector<1x16xf32>
    %cst_9 = arith.constant 9.99999974E-6 : f32
    %17 = vector.broadcast %cst_9 : f32 to vector<1x16xf32>
    %18 = arith.addf %16, %17 : vector<1x16xf32>
    %19 = math.rsqrt %18 : vector<1x16xf32>
    %20 = vector.broadcast %19 : vector<1x16xf32> to vector<128x16xf32>
    %21 = arith.mulf %11, %20 : vector<128x16xf32>
    %cst_10 = arith.constant 0.000000e+00 : f32
    %22 = vector.broadcast %cst_10 : f32 to vector<128x16xf32>
    %23 = arith.cmpf oge, %21, %22 : vector<128x16xf32>
    %cst_11 = arith.constant 2.000000e-01 : f32
    %24 = vector.broadcast %cst_11 : f32 to vector<128x16xf32>
    %25 = arith.mulf %24, %21 : vector<128x16xf32>
    %26 = arith.select %23, %21, %25 : vector<128x16xi1>, vector<128x16xf32>
    %27 = arith.truncf %26 : vector<128x16xf32> to vector<128x16xbf16>
    %c0_12 = arith.constant 0 : index
    %c0_13 = arith.constant 0 : index
    %28 = vector.load %arg4[%c0_12, %c0_13] : memref<128x16xbf16, #tpu.memory_space<vmem>>, vector<128x16xbf16>
    tpu.vector_store %arg4[%c0_12, %c0_13], %27 {strides = array<i32>} : memref<128x16xbf16, #tpu.memory_space<vmem>>, vector<128x16xbf16>,
    return
  }
  func.func @transform_0(%arg0: i32) -> (i32, i32) {
    %c0_i32 = arith.constant 0 : i32
    %c0_i32_0 = arith.constant 0 : i32
    %c0_i32_1 = arith.constant 0 : i32
    return %c0_i32, %c0_i32_0 : i32, i32
  }
  func.func @transform_1(%arg0: i32) -> (i32, i32) {
    %c0_i32 = arith.constant 0 : i32
    %c0_i32_0 = arith.constant 0 : i32
    %c0_i32_1 = arith.constant 0 : i32
    return %c0_i32, %c0_i32_0 : i32, i32
  }
  func.func @transform_2(%arg0: i32) -> (i32, i32) {
    %c0_i32 = arith.constant 0 : i32
    %c0_i32_0 = arith.constant 0 : i32
    %c0_i32_1 = arith.constant 0 : i32
    return %c0_i32, %c0_i32_0 : i32, i32
  }
  func.func @transform_3(%arg0: i32) -> (i32, i32) {
    %c0_i32 = arith.constant 0 : i32
    %c0_i32_0 = arith.constant 0 : i32
    %c0_i32_1 = arith.constant 0 : i32
    return %c0_i32, %c0_i32_0 : i32, i32
  }
}

module attributes {stable_mosaic.version = 11 : i64} {
  func.func @_conv_bn_act_kernel(%arg0: i32, %arg1: memref<32x256xbf16, #tpu.memory_space<vmem>>, %arg2: memref<256x32xbf16, #tpu.memory_space<vmem>>, %arg3: memref<1x32xf32, #tpu.memory_space<vmem>>, %arg4: memref<32x32xbf16, #tpu.memory_space<vmem>>) attributes {dimension_semantics = [#tpu.dimension_semantics<arbitrary>], iteration_bounds = array<i64: 1>, scalar_prefetch = 0 : i64, scratch_operands = 0 : i64, tpu.core_type = #tpu.core_type<tc>, window_params = [{pipeline_mode = #tpu.pipeline_mode<synchronous>, transform_indices = @transform_0, window_bounds = array<i64: 32, 256>}, {pipeline_mode = #tpu.pipeline_mode<synchronous>, transform_indices = @transform_1, window_bounds = array<i64: 256, 32>}, {pipeline_mode = #tpu.pipeline_mode<synchronous>, transform_indices = @transform_2, window_bounds = array<i64: 1, 32>}, {pipeline_mode = #tpu.pipeline_mode<synchronous>, transform_indices = @transform_3, window_bounds = array<i64: 32, 32>}]} {
    %c0 = arith.constant 0 : index
    %c0_0 = arith.constant 0 : index
    %0 = vector.load %arg1[%c0, %c0_0] : memref<32x256xbf16, #tpu.memory_space<vmem>>, vector<32x256xbf16>
    %c0_1 = arith.constant 0 : index
    %c0_2 = arith.constant 0 : index
    %1 = vector.load %arg2[%c0_1, %c0_2] : memref<256x32xbf16, #tpu.memory_space<vmem>>, vector<256x32xbf16>
    %cst = arith.constant dense<0.000000e+00> : vector<32x32xf32>
    %2 = tpu.matmul %0, %1, %cst {dimension_numbers = #tpu.dot_dimension_numbers<[1], [0], [0], [1], [0, 0, 1, 1], [], []>} : vector<32x256xbf16>, vector<256x32xbf16>, vector<32x32xf32> -> vector<32x32xf32>
    %c0_3 = arith.constant 0 : index
    %c0_4 = arith.constant 0 : index
    %3 = vector.load %arg3[%c0_3, %c0_4] : memref<1x32xf32, #tpu.memory_space<vmem>>, vector<1x32xf32>
    %4 = vector.broadcast %3 : vector<1x32xf32> to vector<32x32xf32>
    %5 = arith.addf %2, %4 : vector<32x32xf32>
    %cst_5 = arith.constant dense<0.000000e+00> : vector<32xf32>
    %6 = vector.multi_reduction <add>, %5, %cst_5 [0] : vector<32x32xf32> to vector<32xf32>
    %7 = vector.shape_cast %6 : vector<32xf32> to vector<1x32xf32>
    %cst_6 = arith.constant 3.125000e-02 : f32
    %8 = vector.broadcast %cst_6 : f32 to vector<1x32xf32>
    %9 = arith.mulf %7, %8 : vector<1x32xf32>
    %10 = vector.broadcast %9 : vector<1x32xf32> to vector<32x32xf32>
    %11 = arith.subf %5, %10 : vector<32x32xf32>
    %12 = arith.mulf %11, %11 : vector<32x32xf32>
    %cst_7 = arith.constant dense<0.000000e+00> : vector<32xf32>
    %13 = vector.multi_reduction <add>, %12, %cst_7 [0] : vector<32x32xf32> to vector<32xf32>
    %14 = vector.shape_cast %13 : vector<32xf32> to vector<1x32xf32>
    %cst_8 = arith.constant 3.125000e-02 : f32
    %15 = vector.broadcast %cst_8 : f32 to vector<1x32xf32>
    %16 = arith.mulf %14, %15 : vector<1x32xf32>
    %cst_9 = arith.constant 9.99999974E-6 : f32
    %17 = vector.broadcast %cst_9 : f32 to vector<1x32xf32>
    %18 = arith.addf %16, %17 : vector<1x32xf32>
    %19 = math.rsqrt %18 : vector<1x32xf32>
    %20 = vector.broadcast %19 : vector<1x32xf32> to vector<32x32xf32>
    %21 = arith.mulf %11, %20 : vector<32x32xf32>
    %cst_10 = arith.constant 0.000000e+00 : f32
    %22 = vector.broadcast %cst_10 : f32 to vector<32x32xf32>
    %23 = arith.cmpf oge, %21, %22 : vector<32x32xf32>
    %cst_11 = arith.constant 2.000000e-01 : f32
    %24 = vector.broadcast %cst_11 : f32 to vector<32x32xf32>
    %25 = arith.mulf %24, %21 : vector<32x32xf32>
    %26 = arith.select %23, %21, %25 : vector<32x32xi1>, vector<32x32xf32>
    %27 = arith.truncf %26 : vector<32x32xf32> to vector<32x32xbf16>
    %c0_12 = arith.constant 0 : index
    %c0_13 = arith.constant 0 : index
    %28 = vector.load %arg4[%c0_12, %c0_13] : memref<32x32xbf16, #tpu.memory_space<vmem>>, vector<32x32xbf16>
    tpu.vector_store %arg4[%c0_12, %c0_13], %27 {strides = array<i32>} : memref<32x32xbf16, #tpu.memory_space<vmem>>, vector<32x32xbf16>,
    return
  }
  func.func @transform_0(%arg0: i32) -> (i32, i32) {
    %c0_i32 = arith.constant 0 : i32
    %c0_i32_0 = arith.constant 0 : i32
    %c0_i32_1 = arith.constant 0 : i32
    return %c0_i32, %c0_i32_0 : i32, i32
  }
  func.func @transform_1(%arg0: i32) -> (i32, i32) {
    %c0_i32 = arith.constant 0 : i32
    %c0_i32_0 = arith.constant 0 : i32
    %c0_i32_1 = arith.constant 0 : i32
    return %c0_i32, %c0_i32_0 : i32, i32
  }
  func.func @transform_2(%arg0: i32) -> (i32, i32) {
    %c0_i32 = arith.constant 0 : i32
    %c0_i32_0 = arith.constant 0 : i32
    %c0_i32_1 = arith.constant 0 : i32
    return %c0_i32, %c0_i32_0 : i32, i32
  }
  func.func @transform_3(%arg0: i32) -> (i32, i32) {
    %c0_i32 = arith.constant 0 : i32
    %c0_i32_0 = arith.constant 0 : i32
    %c0_i32_1 = arith.constant 0 : i32
    return %c0_i32, %c0_i32_0 : i32, i32
  }
}

module attributes {stable_mosaic.version = 11 : i64} {
  func.func @_conv_bn_act_kernel(%arg0: i32, %arg1: memref<18x512xbf16, #tpu.memory_space<vmem>>, %arg2: memref<512x64xbf16, #tpu.memory_space<vmem>>, %arg3: memref<1x64xf32, #tpu.memory_space<vmem>>, %arg4: memref<18x64xbf16, #tpu.memory_space<vmem>>) attributes {dimension_semantics = [#tpu.dimension_semantics<arbitrary>], iteration_bounds = array<i64: 1>, scalar_prefetch = 0 : i64, scratch_operands = 0 : i64, tpu.core_type = #tpu.core_type<tc>, window_params = [{pipeline_mode = #tpu.pipeline_mode<synchronous>, transform_indices = @transform_0, window_bounds = array<i64: 18, 512>}, {pipeline_mode = #tpu.pipeline_mode<synchronous>, transform_indices = @transform_1, window_bounds = array<i64: 512, 64>}, {pipeline_mode = #tpu.pipeline_mode<synchronous>, transform_indices = @transform_2, window_bounds = array<i64: 1, 64>}, {pipeline_mode = #tpu.pipeline_mode<synchronous>, transform_indices = @transform_3, window_bounds = array<i64: 18, 64>}]} {
    %c0 = arith.constant 0 : index
    %c0_0 = arith.constant 0 : index
    %0 = vector.load %arg1[%c0, %c0_0] : memref<18x512xbf16, #tpu.memory_space<vmem>>, vector<18x512xbf16>
    %c0_1 = arith.constant 0 : index
    %c0_2 = arith.constant 0 : index
    %1 = vector.load %arg2[%c0_1, %c0_2] : memref<512x64xbf16, #tpu.memory_space<vmem>>, vector<512x64xbf16>
    %cst = arith.constant dense<0.000000e+00> : vector<18x64xf32>
    %2 = tpu.matmul %0, %1, %cst {dimension_numbers = #tpu.dot_dimension_numbers<[1], [0], [0], [1], [0, 0, 1, 1], [], []>} : vector<18x512xbf16>, vector<512x64xbf16>, vector<18x64xf32> -> vector<18x64xf32>
    %c0_3 = arith.constant 0 : index
    %c0_4 = arith.constant 0 : index
    %3 = vector.load %arg3[%c0_3, %c0_4] : memref<1x64xf32, #tpu.memory_space<vmem>>, vector<1x64xf32>
    %4 = vector.broadcast %3 : vector<1x64xf32> to vector<18x64xf32>
    %5 = arith.addf %2, %4 : vector<18x64xf32>
    %cst_5 = arith.constant dense<0.000000e+00> : vector<64xf32>
    %6 = vector.multi_reduction <add>, %5, %cst_5 [0] : vector<18x64xf32> to vector<64xf32>
    %7 = vector.shape_cast %6 : vector<64xf32> to vector<1x64xf32>
    %cst_6 = arith.constant 0.055555556 : f32
    %8 = vector.broadcast %cst_6 : f32 to vector<1x64xf32>
    %9 = arith.mulf %7, %8 : vector<1x64xf32>
    %10 = vector.broadcast %9 : vector<1x64xf32> to vector<18x64xf32>
    %11 = arith.subf %5, %10 : vector<18x64xf32>
    %12 = arith.mulf %11, %11 : vector<18x64xf32>
    %cst_7 = arith.constant dense<0.000000e+00> : vector<64xf32>
    %13 = vector.multi_reduction <add>, %12, %cst_7 [0] : vector<18x64xf32> to vector<64xf32>
    %14 = vector.shape_cast %13 : vector<64xf32> to vector<1x64xf32>
    %cst_8 = arith.constant 0.055555556 : f32
    %15 = vector.broadcast %cst_8 : f32 to vector<1x64xf32>
    %16 = arith.mulf %14, %15 : vector<1x64xf32>
    %cst_9 = arith.constant 9.99999974E-6 : f32
    %17 = vector.broadcast %cst_9 : f32 to vector<1x64xf32>
    %18 = arith.addf %16, %17 : vector<1x64xf32>
    %19 = math.rsqrt %18 : vector<1x64xf32>
    %20 = vector.broadcast %19 : vector<1x64xf32> to vector<18x64xf32>
    %21 = arith.mulf %11, %20 : vector<18x64xf32>
    %cst_10 = arith.constant 0.000000e+00 : f32
    %22 = vector.broadcast %cst_10 : f32 to vector<18x64xf32>
    %23 = arith.cmpf oge, %21, %22 : vector<18x64xf32>
    %cst_11 = arith.constant 2.000000e-01 : f32
    %24 = vector.broadcast %cst_11 : f32 to vector<18x64xf32>
    %25 = arith.mulf %24, %21 : vector<18x64xf32>
    %26 = arith.select %23, %21, %25 : vector<18x64xi1>, vector<18x64xf32>
    %27 = arith.truncf %26 : vector<18x64xf32> to vector<18x64xbf16>
    %c0_12 = arith.constant 0 : index
    %c0_13 = arith.constant 0 : index
    %28 = vector.load %arg4[%c0_12, %c0_13] : memref<18x64xbf16, #tpu.memory_space<vmem>>, vector<18x64xbf16>
    tpu.vector_store %arg4[%c0_12, %c0_13], %27 {strides = array<i32>} : memref<18x64xbf16, #tpu.memory_space<vmem>>, vector<18x64xbf16>,
    return
  }
  func.func @transform_0(%arg0: i32) -> (i32, i32) {
    %c0_i32 = arith.constant 0 : i32
    %c0_i32_0 = arith.constant 0 : i32
    %c0_i32_1 = arith.constant 0 : i32
    return %c0_i32, %c0_i32_0 : i32, i32
  }
  func.func @transform_1(%arg0: i32) -> (i32, i32) {
    %c0_i32 = arith.constant 0 : i32
    %c0_i32_0 = arith.constant 0 : i32
    %c0_i32_1 = arith.constant 0 : i32
    return %c0_i32, %c0_i32_0 : i32, i32
  }
  func.func @transform_2(%arg0: i32) -> (i32, i32) {
    %c0_i32 = arith.constant 0 : i32
    %c0_i32_0 = arith.constant 0 : i32
    %c0_i32_1 = arith.constant 0 : i32
    return %c0_i32, %c0_i32_0 : i32, i32
  }
  func.func @transform_3(%arg0: i32) -> (i32, i32) {
    %c0_i32 = arith.constant 0 : i32
    %c0_i32_0 = arith.constant 0 : i32
    %c0_i32_1 = arith.constant 0 : i32
    return %c0_i32, %c0_i32_0 : i32, i32
  }
}

module attributes {stable_mosaic.version = 11 : i64} {
  func.func @_conv_act_kernel(%arg0: i32, %arg1: memref<8x1024xbf16, #tpu.memory_space<vmem>>, %arg2: memref<1024x1xbf16, #tpu.memory_space<vmem>>, %arg3: memref<1x1xf32, #tpu.memory_space<vmem>>, %arg4: memref<8x1xf32, #tpu.memory_space<vmem>>) attributes {dimension_semantics = [#tpu.dimension_semantics<parallel>], iteration_bounds = array<i64: 1>, scalar_prefetch = 0 : i64, scratch_operands = 0 : i64, tpu.core_type = #tpu.core_type<tc>, window_params = [{transform_indices = @transform_0, window_bounds = array<i64: 8, 1024>}, {pipeline_mode = #tpu.pipeline_mode<synchronous>, transform_indices = @transform_1, window_bounds = array<i64: 1024, 1>}, {pipeline_mode = #tpu.pipeline_mode<synchronous>, transform_indices = @transform_2, window_bounds = array<i64: 1, 1>}, {transform_indices = @transform_3, window_bounds = array<i64: 8, 1>}]} {
    %c0 = arith.constant 0 : index
    %c0_0 = arith.constant 0 : index
    %0 = vector.load %arg1[%c0, %c0_0] : memref<8x1024xbf16, #tpu.memory_space<vmem>>, vector<8x1024xbf16>
    %c0_1 = arith.constant 0 : index
    %c0_2 = arith.constant 0 : index
    %1 = vector.load %arg2[%c0_1, %c0_2] : memref<1024x1xbf16, #tpu.memory_space<vmem>>, vector<1024x1xbf16>
    %cst = arith.constant dense<0.000000e+00> : vector<8x1xf32>
    %2 = tpu.matmul %0, %1, %cst {dimension_numbers = #tpu.dot_dimension_numbers<[1], [0], [0], [1], [0, 0, 1, 1], [], []>} : vector<8x1024xbf16>, vector<1024x1xbf16>, vector<8x1xf32> -> vector<8x1xf32>
    %c0_3 = arith.constant 0 : index
    %c0_4 = arith.constant 0 : index
    %3 = vector.load %arg3[%c0_3, %c0_4] : memref<1x1xf32, #tpu.memory_space<vmem>>, vector<1x1xf32>
    %4 = vector.broadcast %3 : vector<1x1xf32> to vector<8x1xf32>
    %5 = arith.addf %2, %4 : vector<8x1xf32>
    %c0_5 = arith.constant 0 : index
    %c0_6 = arith.constant 0 : index
    %6 = vector.load %arg4[%c0_5, %c0_6] : memref<8x1xf32, #tpu.memory_space<vmem>>, vector<8x1xf32>
    tpu.vector_store %arg4[%c0_5, %c0_6], %5 {strides = array<i32>} : memref<8x1xf32, #tpu.memory_space<vmem>>, vector<8x1xf32>,
    return
  }
  func.func @transform_0(%arg0: i32) -> (i32, i32) {
    %c0_i32 = arith.constant 0 : i32
    %c0_i32_0 = arith.constant 0 : i32
    return %arg0, %c0_i32 : i32, i32
  }
  func.func @transform_1(%arg0: i32) -> (i32, i32) {
    %c0_i32 = arith.constant 0 : i32
    %c0_i32_0 = arith.constant 0 : i32
    %c0_i32_1 = arith.constant 0 : i32
    return %c0_i32, %c0_i32_0 : i32, i32
  }
  func.func @transform_2(%arg0: i32) -> (i32, i32) {
    %c0_i32 = arith.constant 0 : i32
    %c0_i32_0 = arith.constant 0 : i32
    %c0_i32_1 = arith.constant 0 : i32
    return %c0_i32, %c0_i32_0 : i32, i32
  }
  func.func @transform_3(%arg0: i32) -> (i32, i32) {
    %c0_i32 = arith.constant 0 : i32
    %c0_i32_0 = arith.constant 0 : i32
    return %arg0, %c0_i32 : i32, i32
  }
}

</mosaic_0001>

<bundles_post_ra>
// kernel: patchgan_forward.5
= control target key start
LH: loop header
LB: loop body
LE: loop exit
PB: predicated region body
PF: predicated region fallthrough
CT: control target
= control target key end

     0   :  { %s1115_s12 = smov 0   ;;  %s1295_s0 = inlined_call_operand.vmem [shape: bf16[512,96], index: 0, kind: input, shape index: {}]   ;;  %s1296_s1 = inlined_call_operand.vmem [shape: bf16[96,8], index: 1, kind: input, shape index: {}]   ;;  %s1297_s2 = inlined_call_operand.vmem [shape: f32[1,8], index: 2, kind: input, shape index: {}]   ;;  %s1298_s3 = inlined_call_operand.vmem [shape: bf16[512,8], index: 3, kind: output, shape index: {}]  }
   0x1 LB: > { %s865_s13 = sadd.s32 4294967295, %s1093_s12   ;;  %p869_p0 = scmp.ge.s32.totalorder %s1093_s12, 1  ;;  %s1093_s12 = sphi %s1115_s12, %s13_s12  }
   0x2   : > { %p138_p1 = scmp.lt.s32.totalorder %s1093_s12, 3 }
   0x4   : > { %p139_p2 = pnand %p869_p0, %p138_p1 }
   0x5   : > { %v1065_v0 = vld [vmem:[%s1296_s1] sm:$0xff] (!%p139_p2)   ;;  %s870_s16 = sshll.u32 (!%p139_p2), %s865_s13, 5  ;;  %v1066_v1 = vld [vmem:[%s1296_s1 + $0x8] sm:$0xff] (!%p139_p2)   ;;  %v1067_v2 = vld [vmem:[%s1296_s1 + $0x10] sm:$0xff] (!%p139_p2)   ;;  %vm342_vm0 = vcmask (!%p139_p2), 785408   ;;  %vm776_vm1 = vcmask (!%p139_p2), 60416  }
   0x6   : > { %142 = sbr.rel (%p139_p2) target bundleno = 288 (0x120), region = 32  ;;  %p163_p3 = scmp.lt.s32.totalorder (!%p139_p2), %s870_s16, 63  ;;  %1001 = vmatprep.subr.bf16.mxu0 (!%p139_p2), %v1065_v0  ;;  %1045 = vmatprep.subr.bf16.mxu1 (!%p139_p2), %v1065_v0  ;;  %v1068_v3 = vld [vmem:[%s1296_s1 + $0x18] sm:$0xff] (!%p139_p2)   ;;  %v1069_v6 = vld [vmem:[%s1296_s1 + $0x20] sm:$0xff] (!%p139_p2)   ;;  %v1070_v7 = vld [vmem:[%s1296_s1 + $0x28] sm:$0xff] (!%p139_p2)  }
   0x7   : > { %1002 = vmatpush3.bf16.msra.mxu0 (!%p139_p2), %v1065_v0  ;;  %1051 = vmatpush3.bf16.msra.mxu1 (!%p139_p2), %v1065_v0  ;;  %v1186_v22 = vld [vmem:[%s1297_s2] ss:$0 sm:$0xff] (!%p139_p2) }
   0x8   : > { %1003 = vmatprep.subr.bf16.mxu0 (!%p139_p2), %v1066_v1  ;;  %1046 = vmatprep.subr.bf16.mxu1 (!%p139_p2), %v1066_v1 }
   0xb   : > { %1004 = vmatpush3.bf16.msra.mxu0 (!%p139_p2), %v1066_v1  ;;  %1052 = vmatpush3.bf16.msra.mxu1 (!%p139_p2), %v1066_v1 }
   0xc   : > { %1005 = vmatprep.subr.bf16.mxu0 (!%p139_p2), %v1067_v2  ;;  %1047 = vmatprep.subr.bf16.mxu1 (!%p139_p2), %v1067_v2 }
   0xd   : > { %s1300_s16 = smov (!%p163_p3, %s870_s16), 63 }
   0xe   : > { %s871_s21 = sshll.u32 %s1300_s16, 2 }
   0xf   : > { %s1143_s26 = scalar_lea.vmem %s1295_s0, %s871_s21  ;;  %1006 = vmatpush3.bf16.msra.mxu0 %v1067_v2  ;;  %1053 = vmatpush3.bf16.msra.mxu1 %v1067_v2  ;;  %s1197_s8 = scalar_lea.vmem %s1298_s3, %s871_s21 }
  0x10   : > { %v1071_v4 = vld [vmem:[%s1143_s26] sm:$0xff]   ;;  %1007 = vmatprep.subr.bf16.mxu0 %v1068_v3  ;;  %1048 = vmatprep.subr.bf16.mxu1 %v1068_v3  ;;  %v1073_v8 = vld [vmem:[%s1143_s26 + $0x8] sm:$0xff]   ;;  %v1075_v10 = vld [vmem:[%s1143_s26 + $0x10] sm:$0xff]  }
  0x11   : > { %v1072_v5 = vld [vmem:[%s1143_s26 + $0x40] sm:$0xff]   ;;  %1013 = vmatprep.mubr.msk.bf16.mxu0 %vm342_vm0, %v1071_v4  ;;  %v1074_v9 = vld [vmem:[%s1143_s26 + $0x48] sm:$0xff]   ;;  %v1076_v11 = vld [vmem:[%s1143_s26 + $0x50] sm:$0xff]  }
  0x12   : > { %1029 = vmatprep.mubr.msk.bf16.mxu1 %vm342_vm0, %v1072_v5  ;;  %v1077_v12 = vld [vmem:[%s1143_s26 + $0x18] sm:$0xff]   ;;  %v1079_v14 = vld [vmem:[%s1143_s26 + $0x20] sm:$0xff]   ;;  %v1081_v16 = vld [vmem:[%s1143_s26 + $0x28] sm:$0xff]  }
  0x13   : > { %1008 = vmatpush3.bf16.msra.mxu0 %v1068_v3  ;;  %1054 = vmatpush3.bf16.msra.mxu1 %v1068_v3  ;;  %v1078_v13 = vld [vmem:[%s1143_s26 + $0x58] sm:$0xff]   ;;  %v1080_v15 = vld [vmem:[%s1143_s26 + $0x60] sm:$0xff]   ;;  %v1082_v17 = vld [vmem:[%s1143_s26 + $0x68] sm:$0xff]  }
  0x14   : > { %1009 = vmatprep.subr.bf16.mxu0 %v1069_v6  ;;  %1049 = vmatprep.subr.bf16.mxu1 %v1069_v6  ;;  %v1083_v18 = vld [vmem:[%s1143_s26 + $0x30] sm:$0xff]   ;;  %v1085_v20 = vld [vmem:[%s1143_s26 + $0x38] sm:$0xff]  }
  0x15   : > { %v1084_v19 = vld [vmem:[%s1143_s26 + $0x70] sm:$0xff]   ;;  %v1086_v21 = vld [vmem:[%s1143_s26 + $0x78] sm:$0xff]  }
  0x17   : > { %1010 = vmatpush3.bf16.msra.mxu0 %v1069_v6  ;;  %1055 = vmatpush3.bf16.msra.mxu1 %v1069_v6 }
  0x18   : > { %1011 = vmatprep.subr.bf16.mxu0 %v1070_v7  ;;  %1050 = vmatprep.subr.bf16.mxu1 %v1070_v7 }
  0x1b   : > { %1012 = vmatpush3.bf16.msra.mxu0 %v1070_v7  ;;  %1056 = vmatpush3.bf16.msra.mxu1 %v1070_v7 }
  0x1e   : > { %1014 = vmatmul.mubr.msk.bf16.vlgmr.msra.gmra.mrb[0].mxu0 %vm342_vm0, %v1073_v8  ;;  %1030 = vmatmul.mubr.msk.bf16.vlgmr.msra.gmra.mrb[0].mxu1 %vm342_vm0, %v1074_v9 }
  0x1f   : > { %1017 = vmatprep.mubr.msk.bf16.mxu0 %vm342_vm0, %v1075_v10  ;;  %1033 = vmatprep.mubr.msk.bf16.mxu1 %vm342_vm0, %v1076_v11 }
  0x26   : > { %1018 = vmatmul.mubr.msk.bf16.gmra.mrb[4].mxu0 %vm342_vm0, %v1077_v12  ;;  %1034 = vmatmul.mubr.msk.bf16.gmra.mrb[4].mxu1 %vm342_vm0, %v1078_v13 }
  0x27   : > { %1021 = vmatprep.mubr.msk.bf16.mxu0 %vm342_vm0, %v1079_v14  ;;  %1037 = vmatprep.mubr.msk.bf16.mxu1 %vm342_vm0, %v1080_v15 }
  0x2e   : > { %1022 = vmatmul.mubr.msk.bf16.gmra.mrb[8].mxu0 %vm342_vm0, %v1081_v16  ;;  %1038 = vmatmul.mubr.msk.bf16.gmra.mrb[8].mxu1 %vm342_vm0, %v1082_v17 }
  0x2f   : > { %1025 = vmatprep.mubr.msk.bf16.mxu0 %vm342_vm0, %v1083_v18  ;;  %1041 = vmatprep.mubr.msk.bf16.mxu1 %vm342_vm0, %v1084_v19 }
  0x36   : > { %1026 = vmatmul.mubr.msk.bf16.gmra.mrb[12].mxu0 %vm342_vm0, %v1085_v20  ;;  %1042 = vmatmul.mubr.msk.bf16.gmra.mrb[12].mxu1 %vm342_vm0, %v1086_v21 }
  0xf1   : > { %v1015_v23 = vpop.f32.mrb[0].mxu0  ;;  %v1031_v24 = vpop.f32.mrb[0].mxu1 }
  0xf2   : > { %v434_v25 = vadd.f32 %v1015_v23, %v1186_v22  ;;  %v498_v26 = vadd.f32 %v1031_v24, %v1186_v22  ;;  %v425_v27 = vpop.f32.mrb[1].mxu0  ;;  %v489_v28 = vpop.f32.mrb[1].mxu1 }
  0xf3   : > { %v426_v29 = vadd.f32 %v1186_v22, %v425_v27  ;;  %v490_v30 = vadd.f32 %v1186_v22, %v489_v28  ;;  %v1016_v31 = vpop.f32.mrb[2].mxu0  ;;  %v1032_v32 = vpop.f32.mrb[2].mxu1 }
  0xf4   : > { %vm554_vm2 = vcmp.ge.f32.partialorder %v434_v25, 0.0  ;;  %v586_v33 = vmul.f32 0.2, %v434_v25  ;;  %vm570_vm3 = vcmp.ge.f32.partialorder %v498_v26, 0.0  ;;  %v602_v34 = vmul.f32 0.2, %v498_v26 }
  0xf5   : > { %vm552_vm4 = vcmp.ge.f32.partialorder %v426_v29, 0.0  ;;  %v584_v35 = vmul.f32 0.2, %v426_v29  ;;  %vm568_vm5 = vcmp.ge.f32.partialorder %v490_v30, 0.0  ;;  %v600_v36 = vmul.f32 0.2, %v490_v30 }
  0xf6   : > { %v618_v37 = vsel %vm554_vm2, %v434_v25, %v586_v33  ;;  %v634_v38 = vsel %vm570_vm3, %v498_v26, %v602_v34  ;;  %v437_v39 = vadd.f32 %v1016_v31, %v1186_v22  ;;  %v501_v40 = vadd.f32 %v1032_v32, %v1186_v22  ;;  %v428_v41 = vpop.f32.mrb[3].mxu0  ;;  %v492_v42 = vpop.f32.mrb[3].mxu1 }
  0xf7   : > { %v949_v43 = vpack.c.bf16 %v618_v37, %v618_v37  ;;  %v965_v44 = vpack.c.bf16 %v634_v38, %v634_v38  ;;  %v616_v45 = vsel %vm552_vm4, %v426_v29, %v584_v35  ;;  %v632_v46 = vsel %vm568_vm5, %v490_v30, %v600_v36 }
  0xf8   : > { %v947_v47 = vpack.c.bf16 %v616_v45, %v616_v45  ;;  %v963_v48 = vpack.c.bf16 %v632_v46, %v632_v46  ;;  %vm555_vm6 = vcmp.ge.f32.partialorder %v437_v39, 0.0  ;;  %v587_v49 = vmul.f32 0.2, %v437_v39 }
  0xf9   : > { %779 = vst.msk [vmem:[%s1197_s8 + $0x8] sm:$0xf] %vm776_vm1, %v949_v43  ;;  %795 = vst.msk [vmem:[%s1197_s8 + $0x48] sm:$0xf] %vm776_vm1, %v965_v44  ;;  %vm571_vm7 = vcmp.ge.f32.partialorder %v501_v40, 0.0  ;;  %v429_v51 = vadd.f32 %v1186_v22, %v428_v41  ;;  %v493_v52 = vadd.f32 %v1186_v22, %v492_v42  ;;  %v1019_v53 = vpop.f32.mrb[4].mxu0 }
  0xfa   : > { %v603_v50 = vmul.f32 0.2, %v501_v40  ;;  %v1035_v54 = vpop.f32.mrb[4].mxu1  ;;  %777 = vst.msk [vmem:[%s1197_s8] sm:$0xf] %vm776_vm1, %v947_v47  ;;  %v619_v55 = vsel %vm555_vm6, %v437_v39, %v587_v49  ;;  %v450_v56 = vadd.f32 %v1019_v53, %v1186_v22  ;;  %v441_v58 = vpop.f32.mrb[5].mxu0 }
  0xfb   : > { %793 = vst.msk [vmem:[%s1197_s8 + $0x40] sm:$0xf] %vm776_vm1, %v963_v48  ;;  %v514_v57 = vadd.f32 %v1035_v54, %v1186_v22  ;;  %v505_v59 = vpop.f32.mrb[5].mxu1  ;;  %v950_v60 = vpack.c.bf16 %v619_v55, %v619_v55  ;;  %vm553_vm8 = vcmp.ge.f32.partialorder %v429_v51, 0.0  ;;  %v585_v62 = vmul.f32 0.2, %v429_v51 }
  0xfc   : > { %v635_v61 = vsel %vm571_vm7, %v501_v40, %v603_v50  ;;  %v1020_v63 = vpop.f32.mrb[6].mxu0  ;;  %v1036_v0 = vpop.f32.mrb[6].mxu1  ;;  %vm569_vm9 = vcmp.ge.f32.partialorder %v493_v52, 0.0  ;;  %v601_v2 = vmul.f32 0.2, %v493_v52  ;;  %vm558_vm10 = vcmp.ge.f32.partialorder %v450_v56, 0.0 }
  0xfd   : > { %v966_v1 = vpack.c.bf16 %v635_v61, %v635_v61  ;;  %v444_v3 = vpop.f32.mrb[7].mxu0  ;;  %v508_v4 = vpop.f32.mrb[7].mxu1  ;;  %780 = vst.msk [vmem:[%s1197_s8 + $0xc] sm:$0xf] %vm776_vm1, %v950_v60  ;;  %v617_v5 = vsel %vm553_vm8, %v429_v51, %v585_v62  ;;  %v590_v6 = vmul.f32 0.2, %v450_v56  ;;  %v442_v10 = vadd.f32 %v1186_v22, %v441_v58 }
  0xfe   : > { %vm574_vm11 = vcmp.ge.f32.partialorder %v514_v57, 0.0  ;;  %v606_v7 = vmul.f32 0.2, %v514_v57  ;;  %v948_v8 = vpack.c.bf16 %v617_v5, %v617_v5  ;;  %v633_v9 = vsel %vm569_vm9, %v493_v52, %v601_v2 }
  0xff   : > { %796 = vst.msk [vmem:[%s1197_s8 + $0x4c] sm:$0xf] %vm776_vm1, %v966_v1  ;;  %v506_v11 = vadd.f32 %v1186_v22, %v505_v59  ;;  %v964_v12 = vpack.c.bf16 %v633_v9, %v633_v9  ;;  %v622_v13 = vsel %vm558_vm10, %v450_v56, %v590_v6  ;;  %v453_v15 = vadd.f32 %v1020_v63, %v1186_v22 }
 0x100   : > { %v638_v14 = vsel %vm574_vm11, %v514_v57, %v606_v7  ;;  %778 = vst.msk [vmem:[%s1197_s8 + $0x4] sm:$0xf] %vm776_vm1, %v948_v8  ;;  %v953_v16 = vpack.c.bf16 %v622_v13, %v622_v13  ;;  %vm556_vm12 = vcmp.ge.f32.partialorder %v442_v10, 0.0  ;;  %v588_v18 = vmul.f32 0.2, %v442_v10 }
 0x101   : > { %v969_v17 = vpack.c.bf16 %v638_v14, %v638_v14  ;;  %794 = vst.msk [vmem:[%s1197_s8 + $0x44] sm:$0xf] %vm776_vm1, %v964_v12  ;;  %vm572_vm13 = vcmp.ge.f32.partialorder %v506_v11, 0.0  ;;  %v604_v19 = vmul.f32 0.2, %v506_v11  ;;  %vm559_vm14 = vcmp.ge.f32.partialorder %v453_v15, 0.0 }
 0x102   : > { %v591_v20 = vmul.f32 0.2, %v453_v15  ;;  %783 = vst.msk [vmem:[%s1197_s8 + $0x18] sm:$0xf] %vm776_vm1, %v953_v16  ;;  %v620_v21 = vsel %vm556_vm12, %v442_v10, %v588_v18  ;;  %v517_v23 = vadd.f32 %v1036_v0, %v1186_v22  ;;  %v445_v24 = vadd.f32 %v1186_v22, %v444_v3  ;;  %v1023_v26 = vpop.f32.mrb[8].mxu0  ;;  %v1039_v27 = vpop.f32.mrb[8].mxu1 }
 0x103   : > { %799 = vst.msk [vmem:[%s1197_s8 + $0x58] sm:$0xf] %vm776_vm1, %v969_v17  ;;  %v509_v25 = vadd.f32 %v1186_v22, %v508_v4  ;;  %v951_v28 = vpack.c.bf16 %v620_v21, %v620_v21  ;;  %v636_v29 = vsel %vm572_vm13, %v506_v11, %v604_v19  ;;  %v466_v31 = vadd.f32 %v1023_v26, %v1186_v22  ;;  %v457_v32 = vpop.f32.mrb[9].mxu0  ;;  %v521_v33 = vpop.f32.mrb[9].mxu1 }
 0x104   : > { %v623_v30 = vsel %vm559_vm14, %v453_v15, %v591_v20  ;;  %v967_v34 = vpack.c.bf16 %v636_v29, %v636_v29  ;;  %vm575_vm15 = vcmp.ge.f32.partialorder %v517_v23, 0.0  ;;  %v607_v36 = vmul.f32 0.2, %v517_v23  ;;  %v1024_v37 = vpop.f32.mrb[10].mxu0  ;;  %v1040_v38 = vpop.f32.mrb[10].mxu1 }
 0x105   : > { %v954_v35 = vpack.c.bf16 %v623_v30, %v623_v30  ;;  %781 = vst.msk [vmem:[%s1197_s8 + $0x10] sm:$0xf] %vm776_vm1, %v951_v28  ;;  %vm557_vm0 = vcmp.ge.f32.partialorder %v445_v24, 0.0  ;;  %v589_v39 = vmul.f32 0.2, %v445_v24  ;;  %vm573_vm2 = vcmp.ge.f32.partialorder %v509_v25, 0.0 }
 0x106   : > { %v605_v40 = vmul.f32 0.2, %v509_v25  ;;  %797 = vst.msk [vmem:[%s1197_s8 + $0x50] sm:$0xf] %vm776_vm1, %v967_v34  ;;  %v639_v41 = vsel %vm575_vm15, %v517_v23, %v607_v36  ;;  %vm562_vm3 = vcmp.ge.f32.partialorder %v466_v31, 0.0  ;;  %v530_v43 = vadd.f32 %v1039_v27, %v1186_v22  ;;  %v460_v44 = vpop.f32.mrb[11].mxu0 }
 0x107   : > { %784 = vst.msk [vmem:[%s1197_s8 + $0x1c] sm:$0xf] %vm776_vm1, %v954_v35  ;;  %v594_v42 = vmul.f32 0.2, %v466_v31  ;;  %v524_v45 = vpop.f32.mrb[11].mxu1  ;;  %v970_v46 = vpack.c.bf16 %v639_v41, %v639_v41  ;;  %v621_v47 = vsel %vm557_vm0, %v445_v24, %v589_v39  ;;  %v458_v49 = vadd.f32 %v1186_v22, %v457_v32 }
 0x108   : > { %v637_v48 = vsel %vm573_vm2, %v509_v25, %v605_v40  ;;  %v952_v50 = vpack.c.bf16 %v621_v47, %v621_v47  ;;  %vm578_vm4 = vcmp.ge.f32.partialorder %v530_v43, 0.0  ;;  %v610_v54 = vmul.f32 0.2, %v530_v43 }
 0x109   : > { %v968_v51 = vpack.c.bf16 %v637_v48, %v637_v48  ;;  %v626_v52 = vsel %vm562_vm3, %v466_v31, %v594_v42  ;;  %800 = vst.msk [vmem:[%s1197_s8 + $0x5c] sm:$0xf] %vm776_vm1, %v970_v46  ;;  %vm560_vm5 = vcmp.ge.f32.partialorder %v458_v49, 0.0  ;;  %v592_v55 = vmul.f32 0.2, %v458_v49  ;;  %v1027_v56 = vpop.f32.mrb[12].mxu0 }
 0x10a   : > { %v957_v53 = vpack.c.bf16 %v626_v52, %v626_v52  ;;  %782 = vst.msk [vmem:[%s1197_s8 + $0x14] sm:$0xf] %vm776_vm1, %v952_v50  ;;  %v522_v57 = vadd.f32 %v1186_v22, %v521_v33  ;;  %v469_v58 = vadd.f32 %v1024_v37, %v1186_v22  ;;  %v533_v59 = vadd.f32 %v1040_v38, %v1186_v22  ;;  %v1043_v61 = vpop.f32.mrb[12].mxu1  ;;  %v473_v62 = vpop.f32.mrb[13].mxu0 }
 0x10b   : > { %798 = vst.msk [vmem:[%s1197_s8 + $0x54] sm:$0xf] %vm776_vm1, %v968_v51  ;;  %v461_v60 = vadd.f32 %v1186_v22, %v460_v44  ;;  %v642_v63 = vsel %vm578_vm4, %v530_v43, %v610_v54  ;;  %v624_v0 = vsel %vm560_vm5, %v458_v49, %v592_v55  ;;  %v525_v1 = vadd.f32 %v1186_v22, %v524_v45  ;;  %v537_v3 = vpop.f32.mrb[13].mxu1  ;;  %v1028_v4 = vpop.f32.mrb[14].mxu0 }
 0x10c   : > { %787 = vst.msk [vmem:[%s1197_s8 + $0x28] sm:$0xf] %vm776_vm1, %v957_v53  ;;  %v482_v2 = vadd.f32 %v1027_v56, %v1186_v22  ;;  %v973_v5 = vpack.c.bf16 %v642_v63, %v642_v63  ;;  %v955_v6 = vpack.c.bf16 %v624_v0, %v624_v0  ;;  %vm576_vm6 = vcmp.ge.f32.partialorder %v522_v57, 0.0  ;;  %v1044_v8 = vpop.f32.mrb[14].mxu1  ;;  %v476_v9 = vpop.f32.mrb[15].mxu0 }
 0x10d   : > { %v608_v7 = vmul.f32 0.2, %v522_v57  ;;  %vm563_vm7 = vcmp.ge.f32.partialorder %v469_v58, 0.0  ;;  %v595_v10 = vmul.f32 0.2, %v469_v58  ;;  %vm579_vm8 = vcmp.ge.f32.partialorder %v533_v59, 0.0 }
 0x10e   : > { %v611_v11 = vmul.f32 0.2, %v533_v59  ;;  %803 = vst.msk [vmem:[%s1197_s8 + $0x68] sm:$0xf] %vm776_vm1, %v973_v5  ;;  %785 = vst.msk [vmem:[%s1197_s8 + $0x20] sm:$0xf] %vm776_vm1, %v955_v6  ;;  %v546_v26 = vadd.f32 %v1043_v61, %v1186_v22  ;;  %v474_v28 = vadd.f32 %v1186_v22, %v473_v62  ;;  %v538_v29 = vadd.f32 %v1186_v22, %v537_v3 }
 0x10f   : > { %v640_v12 = vsel %vm576_vm6, %v522_v57, %v608_v7  ;;  %vm561_vm9 = vcmp.ge.f32.partialorder %v461_v60, 0.0  ;;  %v593_v13 = vmul.f32 0.2, %v461_v60  ;;  %vm577_vm10 = vcmp.ge.f32.partialorder %v525_v1, 0.0  ;;  %v540_v14 = vpop.f32.mrb[15].mxu1 }
 0x110   : > { %v971_v15 = vpack.c.bf16 %v640_v12, %v640_v12  ;;  %v627_v16 = vsel %vm563_vm7, %v469_v58, %v595_v10  ;;  %v643_v17 = vsel %vm579_vm8, %v533_v59, %v611_v11  ;;  %v609_v18 = vmul.f32 0.2, %v525_v1 }
 0x111   : > { %v958_v19 = vpack.c.bf16 %v627_v16, %v627_v16  ;;  %v974_v20 = vpack.c.bf16 %v643_v17, %v643_v17  ;;  %v625_v21 = vsel %vm561_vm9, %v461_v60, %v593_v13  ;;  %vm566_vm11 = vcmp.ge.f32.partialorder %v482_v2, 0.0 }
 0x112   : > { %801 = vst.msk [vmem:[%s1197_s8 + $0x60] sm:$0xf] %vm776_vm1, %v971_v15  ;;  %v956_v23 = vpack.c.bf16 %v625_v21, %v625_v21  ;;  %v641_v24 = vsel %vm577_vm10, %v525_v1, %v609_v18  ;;  %v598_v25 = vmul.f32 0.2, %v482_v2  ;;  %v485_v30 = vadd.f32 %v1028_v4, %v1186_v22 }
 0x113   : > { %788 = vst.msk [vmem:[%s1197_s8 + $0x2c] sm:$0xf] %vm776_vm1, %v958_v19  ;;  %804 = vst.msk [vmem:[%s1197_s8 + $0x6c] sm:$0xf] %vm776_vm1, %v974_v20  ;;  %v972_v27 = vpack.c.bf16 %v641_v24, %v641_v24  ;;  %vm582_vm12 = vcmp.ge.f32.partialorder %v546_v26, 0.0  ;;  %v549_v33 = vadd.f32 %v1044_v8, %v1186_v22  ;;  %vm564_vm13 = vcmp.ge.f32.partialorder %v474_v28, 0.0 }
 0x114   : > { %786 = vst.msk [vmem:[%s1197_s8 + $0x24] sm:$0xf] %vm776_vm1, %v956_v23  ;;  %v630_v31 = vsel %vm566_vm11, %v482_v2, %v598_v25  ;;  %v614_v32 = vmul.f32 0.2, %v546_v26  ;;  %v596_v35 = vmul.f32 0.2, %v474_v28  ;;  %v477_v45 = vadd.f32 %v1186_v22, %v476_v9 }
 0x115   : > { %802 = vst.msk [vmem:[%s1197_s8 + $0x64] sm:$0xf] %vm776_vm1, %v972_v27  ;;  %v961_v34 = vpack.c.bf16 %v630_v31, %v630_v31  ;;  %vm580_vm14 = vcmp.ge.f32.partialorder %v538_v29, 0.0  ;;  %v612_v37 = vmul.f32 0.2, %v538_v29  ;;  %vm567_vm15 = vcmp.ge.f32.partialorder %v485_v30, 0.0 }
 0x116   : > { %v646_v36 = vsel %vm582_vm12, %v546_v26, %v614_v32  ;;  %v599_v38 = vmul.f32 0.2, %v485_v30  ;;  %v628_v40 = vsel %vm564_vm13, %v474_v28, %v596_v35  ;;  %vm583_vm0 = vcmp.ge.f32.partialorder %v549_v33, 0.0 }
 0x117   : > { %791 = vst.msk [vmem:[%s1197_s8 + $0x38] sm:$0xf] %vm776_vm1, %v961_v34  ;;  %v977_v39 = vpack.c.bf16 %v646_v36, %v646_v36  ;;  %v615_v41 = vmul.f32 0.2, %v549_v33  ;;  %v959_v42 = vpack.c.bf16 %v628_v40, %v628_v40  ;;  %v644_v43 = vsel %vm580_vm14, %v538_v29, %v612_v37 }
 0x118   : > { %v631_v44 = vsel %vm567_vm15, %v485_v30, %v599_v38  ;;  %v975_v46 = vpack.c.bf16 %v644_v43, %v644_v43  ;;  %v541_v49 = vadd.f32 %v1186_v22, %v540_v14  ;;  %vm565_vm2 = vcmp.ge.f32.partialorder %v477_v45, 0.0 }
 0x119   : > { %807 = vst.msk [vmem:[%s1197_s8 + $0x78] sm:$0xf] %vm776_vm1, %v977_v39  ;;  %v962_v47 = vpack.c.bf16 %v631_v44, %v631_v44  ;;  %v647_v48 = vsel %vm583_vm0, %v549_v33, %v615_v41  ;;  %789 = vst.msk [vmem:[%s1197_s8 + $0x30] sm:$0xf] %vm776_vm1, %v959_v42  ;;  %v597_v51 = vmul.f32 0.2, %v477_v45 }
 0x11a   : > { %v978_v50 = vpack.c.bf16 %v647_v48, %v647_v48  ;;  %805 = vst.msk [vmem:[%s1197_s8 + $0x70] sm:$0xf] %vm776_vm1, %v975_v46  ;;  %vm581_vm3 = vcmp.ge.f32.partialorder %v541_v49, 0.0  ;;  %v613_v52 = vmul.f32 0.2, %v541_v49 }
 0x11b   : > { %792 = vst.msk [vmem:[%s1197_s8 + $0x3c] sm:$0xf] %vm776_vm1, %v962_v47  ;;  %v629_v53 = vsel %vm565_vm2, %v477_v45, %v597_v51 }
 0x11c   : > { %808 = vst.msk [vmem:[%s1197_s8 + $0x7c] sm:$0xf] %vm776_vm1, %v978_v50  ;;  %v960_v54 = vpack.c.bf16 %v629_v53, %v629_v53  ;;  %v645_v55 = vsel %vm581_vm3, %v541_v49, %v613_v52 }
 0x11d   : > { %v976_v56 = vpack.c.bf16 %v645_v55, %v645_v55 }
 0x11e   : > { %790 = vst.msk [vmem:[%s1197_s8 + $0x34] sm:$0xf] %vm776_vm1, %v960_v54 }
 0x11f   : > { %806 = vst.msk [vmem:[%s1197_s8 + $0x74] sm:$0xf] %vm776_vm1, %v976_v56 }
 0x120 PF: > { %s13_s12 = sadd.s32 1, %s1093_s12  }
 0x121   : > { %p10_p4 = scmp.ge.s32.totalorder %s13_s12, 4  }
 0x123   :  { %12 = sbr.rel (!%p10_p4) target bundleno = 1 (0x1), region = 62 }

// kernel: patchgan_forward.6
= control target key start
LH: loop header
LB: loop body
LE: loop exit
PB: predicated region body
PF: predicated region fallthrough
CT: control target
= control target key end

     0   :  { %vm247_vm0 = vcmask 130048   ;;  %s909_s1 = inlined_call_operand.vmem [shape: bf16[128,16], index: 1, kind: input, shape index: {}]   ;;  %s910_s0 = inlined_call_operand.vmem [shape: bf16[128,128], index: 0, kind: input, shape index: {}]   ;;  %s911_s2 = inlined_call_operand.vmem [shape: f32[1,16], index: 2, kind: input, shape index: {}]   ;;  %s912_s3 = inlined_call_operand.vmem [shape: bf16[128,16], index: 3, kind: output, shape index: {}]  }
   0x1   :  { %v620_v0 = vld [vmem:[%s909_s1] sm:$0xff]   ;;  %v621_v1 = vld [vmem:[%s909_s1 + $0x8] sm:$0xff]   ;;  %v622_v2 = vld [vmem:[%s909_s1 + $0x10] sm:$0xff]  }
   0x2   :  { %572 = vmatprep.subr.bf16.mxu0 %v620_v0  ;;  %604 = vmatprep.subr.bf16.mxu1 %v620_v0  ;;  %v623_v3 = vld [vmem:[%s909_s1 + $0x18] sm:$0xff]   ;;  %v628_v4 = vld [vmem:[%s910_s0] sm:$0xff]   ;;  %v625_v7 = vld [vmem:[%s909_s1 + $0x28] sm:$0xff]  }
   0x3   :  { %573 = vmatpush3.bf16.msra.mxu0 %v620_v0  ;;  %612 = vmatpush3.bf16.msra.mxu1 %v620_v0  ;;  %v624_v5 = vld [vmem:[%s909_s1 + $0x20] sm:$0xff]   ;;  %v626_v8 = vld [vmem:[%s909_s1 + $0x30] sm:$0xff]   ;;  %v627_v9 = vld [vmem:[%s909_s1 + $0x38] sm:$0xff]  }
   0x4   :  { %574 = vmatprep.subr.bf16.mxu0 %v621_v1  ;;  %605 = vmatprep.subr.bf16.mxu1 %v621_v1  ;;  %v632_v6 = vld [vmem:[%s910_s0 + $0x20] sm:$0xff]   ;;  %v629_v10 = vld [vmem:[%s910_s0 + $0x8] sm:$0xff]   ;;  %v630_v12 = vld [vmem:[%s910_s0 + $0x10] sm:$0xff]  }
   0x5   :  { %588 = vmatprep.mubr.bf16.mxu0 %v628_v4  ;;  %596 = vmatprep.mubr.bf16.mxu1 %v632_v6  ;;  %v633_v11 = vld [vmem:[%s910_s0 + $0x28] sm:$0xff]   ;;  %v634_v13 = vld [vmem:[%s910_s0 + $0x30] sm:$0xff]   ;;  %v631_v14 = vld [vmem:[%s910_s0 + $0x18] sm:$0xff]  }
   0x6   :  { %v635_v15 = vld [vmem:[%s910_s0 + $0x38] sm:$0xff]   ;;  %v507_v16 = vld [vmem:[%s911_s2] ss:$0 sm:$0xff] }
   0x7   :  { %575 = vmatpush3.bf16.msra.mxu0 %v621_v1  ;;  %613 = vmatpush3.bf16.msra.mxu1 %v621_v1 }
   0x8   :  { %576 = vmatprep.subr.bf16.mxu0 %v622_v2  ;;  %606 = vmatprep.subr.bf16.mxu1 %v622_v2 }
   0xb   :  { %577 = vmatpush3.bf16.msra.mxu0 %v622_v2  ;;  %614 = vmatpush3.bf16.msra.mxu1 %v622_v2 }
   0xc   :  { %578 = vmatprep.subr.bf16.mxu0 %v623_v3  ;;  %607 = vmatprep.subr.bf16.mxu1 %v623_v3 }
   0xf   :  { %579 = vmatpush3.bf16.msra.mxu0 %v623_v3  ;;  %615 = vmatpush3.bf16.msra.mxu1 %v623_v3 }
  0x10   :  { %580 = vmatprep.subr.bf16.mxu0 %v624_v5  ;;  %608 = vmatprep.subr.bf16.mxu1 %v624_v5 }
  0x13   :  { %581 = vmatpush3.bf16.msra.mxu0 %v624_v5  ;;  %616 = vmatpush3.bf16.msra.mxu1 %v624_v5 }
  0x14   :  { %582 = vmatprep.subr.bf16.mxu0 %v625_v7  ;;  %609 = vmatprep.subr.bf16.mxu1 %v625_v7 }
  0x17   :  { %583 = vmatpush3.bf16.msra.mxu0 %v625_v7  ;;  %617 = vmatpush3.bf16.msra.mxu1 %v625_v7 }
  0x18   :  { %584 = vmatprep.subr.bf16.mxu0 %v626_v8  ;;  %610 = vmatprep.subr.bf16.mxu1 %v626_v8 }
  0x1b   :  { %585 = vmatpush3.bf16.msra.mxu0 %v626_v8  ;;  %618 = vmatpush3.bf16.msra.mxu1 %v626_v8 }
  0x1c   :  { %586 = vmatprep.subr.bf16.mxu0 %v627_v9  ;;  %611 = vmatprep.subr.bf16.mxu1 %v627_v9 }
  0x1f   :  { %587 = vmatpush3.bf16.msra.mxu0 %v627_v9  ;;  %619 = vmatpush3.bf16.msra.mxu1 %v627_v9 }
  0x22   :  { %589 = vmatmul.mubr.bf16.vlgmr.msra.gmra.mrb[0].mxu0 %v629_v10  ;;  %597 = vmatmul.mubr.bf16.vlgmr.msra.gmra.mrb[0].mxu1 %v633_v11 }
  0x23   :  { %592 = vmatprep.mubr.bf16.mxu0 %v630_v12  ;;  %600 = vmatprep.mubr.bf16.mxu1 %v634_v13 }
  0x2a   :  { %593 = vmatmul.mubr.bf16.gmra.mrb[4].mxu0 %v631_v14  ;;  %601 = vmatmul.mubr.bf16.gmra.mrb[4].mxu1 %v635_v15 }
  0xf5   :  { %v590_v17 = vpop.f32.mrb[0].mxu0  ;;  %v598_v18 = vpop.f32.mrb[0].mxu1 }
  0xf6   :  { %v184_v19 = vpop.f32.mrb[1].mxu0  ;;  %v216_v20 = vpop.f32.mrb[1].mxu1  ;;  %v711_v26 = vadd.f32 %v590_v17, %v507_v16  ;;  %v225_v59 = vadd.f32 %v598_v18, %v507_v16 }
  0xf7   :  { %v709_v21 = vadd.f32 %v507_v16, %v184_v19  ;;  %v591_v22 = vpop.f32.mrb[2].mxu0  ;;  %v599_v23 = vpop.f32.mrb[2].mxu1  ;;  %v217_v51 = vadd.f32 %v507_v16, %v216_v20 }
  0xf8   :  { %v187_v24 = vpop.f32.mrb[3].mxu0  ;;  %v219_v25 = vpop.f32.mrb[3].mxu1  ;;  %v196_v29 = vadd.f32 %v591_v22, %v507_v16  ;;  %v251_v32 = vsel %vm247_vm0, %v711_v26, 0.0  ;;  %v228_v61 = vadd.f32 %v599_v23, %v507_v16  ;;  %v267_v1 = vsel %vm247_vm0, %v225_v59, 0.0 }
  0xf9   :  { %v188_v27 = vadd.f32 %v507_v16, %v187_v24  ;;  %v248_v28 = vsel %vm247_vm0, %v709_v21, 0.0  ;;  %v263_v56 = vsel %vm247_vm0, %v217_v51, 0.0  ;;  %v220_v57 = vadd.f32 %v507_v16, %v219_v25 }
  0xfa   :  { %v253_v38 = vsel %vm247_vm0, %v196_v29, 0.0  ;;  %v269_v3 = vsel %vm247_vm0, %v228_v61, 0.0 }
  0xfb   :  { %v249_v30 = vsel %vm247_vm0, %v188_v27, 0.0  ;;  %v265_v62 = vsel %vm247_vm0, %v220_v57, 0.0 }
  0xfc   :  { %v250_v31 = vadd.f32 %v249_v30, %v248_v28 }
  0xfd   :  { %v594_v33 = vpop.f32.mrb[4].mxu0  ;;  %v602_v34 = vpop.f32.mrb[4].mxu1 }
  0xfe   :  { %v252_v35 = vadd.f32 %v251_v32, %v250_v31  ;;  %v200_v36 = vpop.f32.mrb[5].mxu0  ;;  %v232_v37 = vpop.f32.mrb[5].mxu1  ;;  %v209_v45 = vadd.f32 %v594_v33, %v507_v16  ;;  %v241_v7 = vadd.f32 %v602_v34, %v507_v16 }
  0xff   :  { %v201_v39 = vadd.f32 %v507_v16, %v200_v36  ;;  %v595_v40 = vpop.f32.mrb[6].mxu0  ;;  %v603_v41 = vpop.f32.mrb[6].mxu1  ;;  %v233_v63 = vadd.f32 %v507_v16, %v232_v37 }
 0x100   :  { %v254_v42 = vadd.f32 %v253_v38, %v252_v35  ;;  %v203_v43 = vpop.f32.mrb[7].mxu0  ;;  %v235_v44 = vpop.f32.mrb[7].mxu1  ;;  %v212_v49 = vadd.f32 %v595_v40, %v507_v16  ;;  %v259_v53 = vsel %vm247_vm0, %v209_v45, 0.0  ;;  %v244_v9 = vadd.f32 %v603_v41, %v507_v16 }
 0x101   :  { %v255_v46 = vsel %vm247_vm0, %v201_v39, 0.0  ;;  %v204_v47 = vadd.f32 %v507_v16, %v203_v43  ;;  %v271_v4 = vsel %vm247_vm0, %v233_v63, 0.0  ;;  %v236_v5 = vadd.f32 %v507_v16, %v235_v44 }
 0x102   :  { %v256_v48 = vadd.f32 %v255_v46, %v254_v42  ;;  %v261_v55 = vsel %vm247_vm0, %v212_v49, 0.0  ;;  %v275_v12 = vsel %vm247_vm0, %v241_v7, 0.0  ;;  %v277_v14 = vsel %vm247_vm0, %v244_v9, 0.0 }
 0x103   :  { %v257_v50 = vsel %vm247_vm0, %v204_v47, 0.0  ;;  %v273_v10 = vsel %vm247_vm0, %v236_v5, 0.0 }
 0x104   :  { %v258_v52 = vadd.f32 %v257_v50, %v256_v48 }
 0x106   :  { %v260_v54 = vadd.f32 %v259_v53, %v258_v52 }
 0x108   :  { %v262_v58 = vadd.f32 %v261_v55, %v260_v54 }
 0x10a   :  { %v264_v60 = vadd.f32 %v263_v56, %v262_v58 }
 0x10c   :  { %v266_v0 = vadd.f32 %v265_v62, %v264_v60 }
 0x10e   :  { %v268_v2 = vadd.f32 %v267_v1, %v266_v0 }
 0x110   :  { %v270_v6 = vadd.f32 %v269_v3, %v268_v2 }
 0x112   :  { %v272_v8 = vadd.f32 %v271_v4, %v270_v6 }
 0x114   :  { %v274_v11 = vadd.f32 %v273_v10, %v272_v8 }
 0x116   :  { %v276_v13 = vadd.f32 %v275_v12, %v274_v11 }
 0x118   :  { %v278_v15 = vadd.f32 %v277_v14, %v276_v13 }
 0x11a   :  { %v279_v17 = vrot.slane %v278_v15, 4 }
 0x11c   :  { %v280_v18 = vadd.f32 %v279_v17, %v278_v15 }
 0x11e   :  { %v281_v19 = vrot.slane %v280_v18, 2 }
 0x120   :  { %v282_v20 = vadd.f32 %v281_v19, %v280_v18 }
 0x122   :  { %v283_v22 = vrot.slane %v282_v20, 1 }
 0x124   :  { %v284_v23 = vadd.f32 %v283_v22, %v282_v20 }
 0x126   :  { %v285_v24 = vmul.f32 0.0078125, %v284_v23 }
 0x128   :  { %v732_v25 = vsub.f32 %v709_v21, %v285_v24  ;;  %v734_v16 = vsub.f32 %v188_v27, %v285_v24  ;;  %v737_v28 = vsub.f32 %v711_v26, %v285_v24  ;;  %v739_v30 = vsub.f32 %v196_v29, %v285_v24 }
 0x129   :  { %v741_v31 = vsub.f32 %v201_v39, %v285_v24  ;;  %v743_v32 = vsub.f32 %v204_v47, %v285_v24  ;;  %v745_v33 = vsub.f32 %v209_v45, %v285_v24  ;;  %v747_v34 = vsub.f32 %v212_v49, %v285_v24 }
 0x12a   :  { %v749_v35 = vsub.f32 %v217_v51, %v285_v24  ;;  %v751_v36 = vsub.f32 %v220_v57, %v285_v24  ;;  %v753_v21 = vsub.f32 %v225_v59, %v285_v24  ;;  %v755_v27 = vsub.f32 %v228_v61, %v285_v24 }
 0x12b   :  { %v757_v26 = vsub.f32 %v233_v63, %v285_v24  ;;  %v759_v29 = vsub.f32 %v236_v5, %v285_v24  ;;  %v761_v37 = vsub.f32 %v241_v7, %v285_v24  ;;  %v763_v38 = vsub.f32 %v244_v9, %v285_v24 }
 0x12c   :  { %v302_v39 = vmul.f32 %v732_v25, %v732_v25  ;;  %v303_v40 = vmul.f32 %v734_v16, %v734_v16  ;;  %v304_v41 = vmul.f32 %v737_v28, %v737_v28  ;;  %v311_v42 = vmul.f32 %v751_v36, %v751_v36 }
 0x12d   :  { %v312_v43 = vmul.f32 %v753_v21, %v753_v21  ;;  %v305_v44 = vmul.f32 %v739_v30, %v739_v30  ;;  %v313_v45 = vmul.f32 %v755_v27, %v755_v27  ;;  %v314_v46 = vmul.f32 %v757_v26, %v757_v26 }
 0x12e   :  { %v315_v47 = vmul.f32 %v759_v29, %v759_v29  ;;  %v316_v48 = vmul.f32 %v761_v37, %v761_v37  ;;  %v317_v49 = vmul.f32 %v763_v38, %v763_v38  ;;  %v318_v50 = vsel %vm247_vm0, %v302_v39, 0.0 }
 0x12f   :  { %v319_v51 = vsel %vm247_vm0, %v303_v40, 0.0  ;;  %v306_v53 = vmul.f32 %v741_v31, %v741_v31  ;;  %v321_v54 = vsel %vm247_vm0, %v304_v41, 0.0  ;;  %v335_v55 = vsel %vm247_vm0, %v311_v42, 0.0 }
 0x130   :  { %v320_v52 = vadd.f32 %v319_v51, %v318_v50  ;;  %v337_v56 = vsel %vm247_vm0, %v312_v43, 0.0  ;;  %v339_v58 = vsel %vm247_vm0, %v313_v45, 0.0  ;;  %v341_v59 = vsel %vm247_vm0, %v314_v46, 0.0 }
 0x131   :  { %v343_v60 = vsel %vm247_vm0, %v315_v47, 0.0  ;;  %v307_v61 = vmul.f32 %v743_v32, %v743_v32  ;;  %v323_v62 = vsel %vm247_vm0, %v305_v44, 0.0  ;;  %v345_v63 = vsel %vm247_vm0, %v316_v48, 0.0 }
 0x132   :  { %v322_v57 = vadd.f32 %v321_v54, %v320_v52  ;;  %v347_v0 = vsel %vm247_vm0, %v317_v49, 0.0  ;;  %v308_v2 = vmul.f32 %v745_v33, %v745_v33  ;;  %v325_v3 = vsel %vm247_vm0, %v306_v53, 0.0 }
 0x133   :  { %v309_v5 = vmul.f32 %v747_v34, %v747_v34  ;;  %v327_v6 = vsel %vm247_vm0, %v307_v61, 0.0  ;;  %v310_v8 = vmul.f32 %v749_v35, %v749_v35 }
 0x134   :  { %v324_v1 = vadd.f32 %v323_v62, %v322_v57  ;;  %v329_v9 = vsel %vm247_vm0, %v308_v2, 0.0 }
 0x135   :  { %v331_v11 = vsel %vm247_vm0, %v309_v5, 0.0  ;;  %v333_v13 = vsel %vm247_vm0, %v310_v8, 0.0 }
 0x136   :  { %v326_v4 = vadd.f32 %v325_v3, %v324_v1 }
 0x138   :  { %v328_v7 = vadd.f32 %v327_v6, %v326_v4 }
 0x13a   :  { %v330_v10 = vadd.f32 %v329_v9, %v328_v7 }
 0x13c   :  { %v332_v12 = vadd.f32 %v331_v11, %v330_v10 }
 0x13e   :  { %v334_v14 = vadd.f32 %v333_v13, %v332_v12 }
 0x140   :  { %v336_v15 = vadd.f32 %v335_v55, %v334_v14 }
 0x142   :  { %v338_v17 = vadd.f32 %v337_v56, %v336_v15 }
 0x144   :  { %v340_v18 = vadd.f32 %v339_v58, %v338_v17 }
 0x146   :  { %v342_v19 = vadd.f32 %v341_v59, %v340_v18 }
 0x148   :  { %v344_v20 = vadd.f32 %v343_v60, %v342_v19 }
 0x14a   :  { %v346_v22 = vadd.f32 %v345_v63, %v344_v20 }
 0x14c   :  { %v348_v23 = vadd.f32 %v347_v0, %v346_v22 }
 0x14e   :  { %v349_v24 = vrot.slane %v348_v23, 4 }
 0x150   :  { %v350_v39 = vadd.f32 %v349_v24, %v348_v23 }
 0x152   :  { %v351_v40 = vrot.slane %v350_v39, 2 }
 0x154   :  { %v352_v41 = vadd.f32 %v351_v40, %v350_v39 }
 0x156   :  { %v353_v42 = vrot.slane %v352_v41, 1 }
 0x158   :  { %v354_v43 = vadd.f32 %v353_v42, %v352_v41 }
 0x15a   :  { %v355_v44 = vmul.f32 0.0078125, %v354_v43 }
 0x15c   :  { %v356_v45 = vadd.f32 1e-05, %v355_v44 }
 0x15e   :  { %636 = vrsqrt.f32 %v356_v45 }
 0x168   :  { %v637_v46 = vpop.eup %636 }
 0x169   :  { %v358_v47 = vmul.f32 %v637_v46, %v732_v25  ;;  %v359_v48 = vmul.f32 %v637_v46, %v734_v16  ;;  %v360_v49 = vmul.f32 %v637_v46, %v737_v28  ;;  %v361_v50 = vmul.f32 %v637_v46, %v739_v30 }
 0x16a   :  { %v362_v51 = vmul.f32 %v637_v46, %v741_v31  ;;  %v363_v52 = vmul.f32 %v637_v46, %v743_v32  ;;  %v364_v53 = vmul.f32 %v637_v46, %v745_v33  ;;  %v365_v54 = vmul.f32 %v637_v46, %v747_v34 }
 0x16b   :  { %v366_v55 = vmul.f32 %v637_v46, %v749_v35  ;;  %v367_v56 = vmul.f32 %v637_v46, %v751_v36  ;;  %v368_v25 = vmul.f32 %v637_v46, %v753_v21  ;;  %v369_v16 = vmul.f32 %v637_v46, %v755_v27 }
 0x16c   :  { %v370_v28 = vmul.f32 %v637_v46, %v757_v26  ;;  %v371_v30 = vmul.f32 %v637_v46, %v759_v29  ;;  %v372_v31 = vmul.f32 %v637_v46, %v761_v37  ;;  %v373_v32 = vmul.f32 %v637_v46, %v763_v38 }
 0x16d   :  { %vm375_vm2 = vcmp.ge.f32.partialorder %v359_v48, 0.0  ;;  %vm376_vm3 = vcmp.ge.f32.partialorder %v360_v49, 0.0  ;;  %vm377_vm4 = vcmp.ge.f32.partialorder %v361_v50, 0.0  ;;  %vm378_vm5 = vcmp.ge.f32.partialorder %v362_v51, 0.0 }
 0x16e   :  { %vm379_vm6 = vcmp.ge.f32.partialorder %v363_v52, 0.0  ;;  %vm381_vm8 = vcmp.ge.f32.partialorder %v365_v54, 0.0  ;;  %vm382_vm9 = vcmp.ge.f32.partialorder %v366_v55, 0.0  ;;  %vm383_vm10 = vcmp.ge.f32.partialorder %v367_v56, 0.0 }
 0x16f   :  { %vm384_vm11 = vcmp.ge.f32.partialorder %v368_v25, 0.0  ;;  %vm385_vm12 = vcmp.ge.f32.partialorder %v369_v16, 0.0  ;;  %vm386_vm13 = vcmp.ge.f32.partialorder %v370_v28, 0.0  ;;  %vm387_vm14 = vcmp.ge.f32.partialorder %v371_v30, 0.0 }
 0x170   :  { %vm388_vm15 = vcmp.ge.f32.partialorder %v372_v31, 0.0  ;;  %vm389_vm0 = vcmp.ge.f32.partialorder %v373_v32, 0.0  ;;  %v390_v33 = vmul.f32 0.2, %v358_v47  ;;  %v391_v34 = vmul.f32 0.2, %v359_v48 }
 0x171   :  { %v392_v35 = vmul.f32 0.2, %v360_v49  ;;  %v393_v36 = vmul.f32 0.2, %v361_v50  ;;  %v394_v21 = vmul.f32 0.2, %v362_v51 }
 0x172   :  { %v395_v27 = vmul.f32 0.2, %v363_v52  ;;  %v396_v26 = vmul.f32 0.2, %v364_v53  ;;  %v397_v29 = vmul.f32 0.2, %v365_v54  ;;  %v407_v60 = vsel %vm375_vm2, %v359_v48, %v391_v34 }
 0x173   :  { %v398_v37 = vmul.f32 0.2, %v366_v55  ;;  %vm913_vm7 = vcmp.ge.f32.partialorder %v358_v47, 0.0  ;;  %v399_v57 = vmul.f32 0.2, %v367_v56  ;;  %v408_v0 = vsel %vm376_vm3, %v360_v49, %v392_v35 }
 0x174   :  { %v406_v38 = vsel %vm913_vm7, %v358_v47, %v390_v33  ;;  %v400_v58 = vmul.f32 0.2, %v368_v25  ;;  %v401_v59 = vmul.f32 0.2, %v369_v16  ;;  %v402_v61 = vmul.f32 0.2, %v370_v28 }
 0x175   :  { %v403_v62 = vmul.f32 0.2, %v371_v30  ;;  %v404_v63 = vmul.f32 0.2, %v372_v31  ;;  %v405_v1 = vmul.f32 0.2, %v373_v32  ;;  %v409_v2 = vsel %vm377_vm4, %v361_v50, %v393_v36 }
 0x176   :  { %v410_v3 = vsel %vm378_vm5, %v362_v51, %v394_v21  ;;  %v411_v4 = vsel %vm379_vm6, %v363_v52, %v395_v27  ;;  %vm914_vm1 = vcmp.ge.f32.partialorder %v364_v53, 0.0  ;;  %v413_v6 = vsel %vm381_vm8, %v365_v54, %v397_v29 }
 0x177   :  { %v412_v5 = vsel %vm914_vm1, %v364_v53, %v396_v26  ;;  %v414_v7 = vsel %vm382_vm9, %v366_v55, %v398_v37  ;;  %v415_v8 = vsel %vm383_vm10, %v367_v56, %v399_v57  ;;  %v416_v9 = vsel %vm384_vm11, %v368_v25, %v400_v58 }
 0x178   :  { %v417_v10 = vsel %vm385_vm12, %v369_v16, %v401_v59  ;;  %v418_v11 = vsel %vm386_vm13, %v370_v28, %v402_v61  ;;  %v419_v12 = vsel %vm387_vm14, %v371_v30, %v403_v62  ;;  %v420_v13 = vsel %vm388_vm15, %v372_v31, %v404_v63 }
 0x179   :  { %v421_v14 = vsel %vm389_vm0, %v373_v32, %v405_v1  ;;  %v540_v15 = vpack.c.bf16 %v406_v38, %v406_v38  ;;  %v541_v17 = vpack.c.bf16 %v407_v60, %v407_v60  ;;  %v542_v18 = vpack.c.bf16 %v408_v0, %v408_v0 }
 0x17a   :  { %v543_v19 = vpack.c.bf16 %v409_v2, %v409_v2  ;;  %v544_v20 = vpack.c.bf16 %v410_v3, %v410_v3  ;;  %v545_v22 = vpack.c.bf16 %v411_v4, %v411_v4  ;;  %v546_v23 = vpack.c.bf16 %v412_v5, %v412_v5 }
 0x17b   :  { %v547_v24 = vpack.c.bf16 %v413_v6, %v413_v6  ;;  %v548_v39 = vpack.c.bf16 %v414_v7, %v414_v7  ;;  %v549_v40 = vpack.c.bf16 %v415_v8, %v415_v8  ;;  %vm915_vm1 = vcmask 125952  }
 0x17c   :  { %487 = vst.msk [vmem:[%s912_s3] sm:$0xf] %vm915_vm1, %v540_v15  ;;  %vm916_vm2 = vmmov %vm915_vm1  ;;  %v550_v41 = vpack.c.bf16 %v416_v9, %v416_v9  ;;  %v551_v42 = vpack.c.bf16 %v417_v10, %v417_v10  ;;  %v552_v43 = vpack.c.bf16 %v418_v11, %v418_v11  ;;  %v553_v44 = vpack.c.bf16 %v419_v12, %v419_v12 }
 0x17d   :  { %488 = vst.msk [vmem:[%s912_s3 + $0x4] sm:$0xf] %vm916_vm2, %v541_v17  ;;  %vm917_vm3 = vmmov %vm915_vm1  ;;  %v554_v45 = vpack.c.bf16 %v420_v13, %v420_v13  ;;  %v555_v46 = vpack.c.bf16 %v421_v14, %v421_v14 }
 0x17e   :  { %489 = vst.msk [vmem:[%s912_s3 + $0x8] sm:$0xf] %vm917_vm3, %v542_v18  ;;  %vm918_vm4 = vmmov %vm915_vm1 }
 0x17f   :  { %490 = vst.msk [vmem:[%s912_s3 + $0xc] sm:$0xf] %vm918_vm4, %v543_v19  ;;  %vm919_vm5 = vmmov %vm915_vm1 }
 0x180   :  { %491 = vst.msk [vmem:[%s912_s3 + $0x10] sm:$0xf] %vm919_vm5, %v544_v20  ;;  %vm920_vm6 = vmmov %vm915_vm1 }
 0x181   :  { %492 = vst.msk [vmem:[%s912_s3 + $0x14] sm:$0xf] %vm920_vm6, %v545_v22  ;;  %vm921_vm7 = vmmov %vm915_vm1 }
 0x182   :  { %493 = vst.msk [vmem:[%s912_s3 + $0x18] sm:$0xf] %vm921_vm7, %v546_v23  ;;  %vm922_vm8 = vmmov %vm915_vm1 }
 0x183   :  { %494 = vst.msk [vmem:[%s912_s3 + $0x1c] sm:$0xf] %vm922_vm8, %v547_v24  ;;  %vm923_vm9 = vmmov %vm915_vm1 }
 0x184   :  { %495 = vst.msk [vmem:[%s912_s3 + $0x20] sm:$0xf] %vm923_vm9, %v548_v39  ;;  %vm924_vm10 = vmmov %vm915_vm1 }
 0x185   :  { %496 = vst.msk [vmem:[%s912_s3 + $0x24] sm:$0xf] %vm924_vm10, %v549_v40  ;;  %vm925_vm11 = vmmov %vm915_vm1 }
 0x186   :  { %497 = vst.msk [vmem:[%s912_s3 + $0x28] sm:$0xf] %vm925_vm11, %v550_v41  ;;  %vm926_vm12 = vmmov %vm915_vm1 }
 0x187   :  { %498 = vst.msk [vmem:[%s912_s3 + $0x2c] sm:$0xf] %vm926_vm12, %v551_v42  ;;  %vm927_vm13 = vmmov %vm915_vm1 }
 0x188   :  { %499 = vst.msk [vmem:[%s912_s3 + $0x30] sm:$0xf] %vm927_vm13, %v552_v43  ;;  %vm928_vm14 = vmmov %vm915_vm1 }
 0x189   :  { %500 = vst.msk [vmem:[%s912_s3 + $0x34] sm:$0xf] %vm928_vm14, %v553_v44  ;;  %vm929_vm15 = vmmov %vm915_vm1 }
 0x18a   :  { %501 = vst.msk [vmem:[%s912_s3 + $0x38] sm:$0xf] %vm929_vm15, %v554_v45  ;;  %vm930_vm0 = vmmov %vm915_vm1 }
 0x18b   :  { %502 = vst.msk [vmem:[%s912_s3 + $0x3c] sm:$0xf] %vm930_vm0, %v555_v46 }

// kernel: patchgan_forward.7
= control target key start
LH: loop header
LB: loop body
LE: loop exit
PB: predicated region body
PF: predicated region fallthrough
CT: control target
= control target key end

     0   :  { %vm223_vm0 = vcmask 261120   ;;  %vm294_vm5 = vcmask 257024   ;;  %s503_s1 = inlined_call_operand.vmem [shape: bf16[256,32], index: 1, kind: input, shape index: {}]   ;;  %s504_s0 = inlined_call_operand.vmem [shape: bf16[32,256], index: 0, kind: input, shape index: {}]   ;;  %s505_s2 = inlined_call_operand.vmem [shape: f32[1,32], index: 2, kind: input, shape index: {}]   ;;  %s506_s3 = inlined_call_operand.vmem [shape: bf16[32,32], index: 3, kind: output, shape index: {}]  }
   0x1   :  { %v376_v0 = vld [vmem:[%s503_s1 + $0x40] sm:$0xff]   ;;  %v378_v2 = vld [vmem:[%s503_s1 + $0x48] sm:$0xff]   ;;  %v380_v4 = vld [vmem:[%s503_s1 + $0x50] sm:$0xff]  }
   0x2   :  { %v377_v1 = vld [vmem:[%s503_s1] sm:$0xff]   ;;  %332 = vmatprep.subr.bf16.mxu0 %v376_v0  ;;  %360 = vmatprep.subr.bf16.mxu1 %v376_v0  ;;  %v379_v3 = vld [vmem:[%s503_s1 + $0x8] sm:$0xff]   ;;  %v381_v5 = vld [vmem:[%s503_s1 + $0x10] sm:$0xff]  }
   0x3   :  { %333 = vmatpush3.bf16.msra.mxu0 %v377_v1  ;;  %368 = vmatpush3.bf16.msra.mxu1 %v377_v1  ;;  %v382_v6 = vld [vmem:[%s503_s1 + $0x58] sm:$0xff]   ;;  %v384_v8 = vld [vmem:[%s503_s1 + $0x60] sm:$0xff]   ;;  %v386_v10 = vld [vmem:[%s503_s1 + $0x68] sm:$0xff]  }
   0x4   :  { %334 = vmatprep.subr.bf16.mxu0 %v378_v2  ;;  %361 = vmatprep.subr.bf16.mxu1 %v378_v2  ;;  %v383_v7 = vld [vmem:[%s503_s1 + $0x18] sm:$0xff]   ;;  %v385_v9 = vld [vmem:[%s503_s1 + $0x20] sm:$0xff]   ;;  %v387_v13 = vld [vmem:[%s503_s1 + $0x28] sm:$0xff]  }
   0x5   :  { %v394_v11 = vld [vmem:[%s504_s0 + $0x4] ss:$8 sps:$4 sm:$0xff]   ;;  %v397_v12 = vld [vmem:[%s504_s0 + $0x14] ss:$8 sps:$4 sm:$0xff]   ;;  %v392_v18 = vld [vmem:[%s504_s0] ss:$8 sps:$4 sm:$0xff]  }
   0x6   :  { %v388_v14 = vld [vmem:[%s503_s1 + $0x70] sm:$0xff]   ;;  %206 = vmatprep.mubr.bf16.mxu0 %v394_v11  ;;  %214 = vmatprep.mubr.bf16.mxu1 %v397_v12  ;;  %v390_v16 = vld [vmem:[%s503_s1 + $0x78] sm:$0xff]   ;;  %v303_v22 = vld [vmem:[%s505_s2] ss:$0 sm:$0xff] }
   0x7   :  { %335 = vmatpush3.bf16.msra.mxu0 %v379_v3  ;;  %369 = vmatpush3.bf16.msra.mxu1 %v379_v3  ;;  %v389_v15 = vld [vmem:[%s503_s1 + $0x30] sm:$0xff]   ;;  %v391_v17 = vld [vmem:[%s503_s1 + $0x38] sm:$0xff]  }
   0x8   :  { %336 = vmatprep.subr.bf16.mxu0 %v380_v4  ;;  %362 = vmatprep.subr.bf16.mxu1 %v380_v4  ;;  %v395_v19 = vld [vmem:[%s504_s0 + $0x10] ss:$8 sps:$4 sm:$0xff]  }
   0xb   :  { %337 = vmatpush3.bf16.msra.mxu0 %v381_v5  ;;  %370 = vmatpush3.bf16.msra.mxu1 %v381_v5 }
   0xc   :  { %338 = vmatprep.subr.bf16.mxu0 %v382_v6  ;;  %363 = vmatprep.subr.bf16.mxu1 %v382_v6 }
   0xf   :  { %339 = vmatpush3.bf16.msra.mxu0 %v383_v7  ;;  %371 = vmatpush3.bf16.msra.mxu1 %v383_v7 }
  0x10   :  { %340 = vmatprep.subr.bf16.mxu0 %v384_v8  ;;  %364 = vmatprep.subr.bf16.mxu1 %v384_v8 }
  0x13   :  { %341 = vmatpush3.bf16.msra.mxu0 %v385_v9  ;;  %372 = vmatpush3.bf16.msra.mxu1 %v385_v9 }
  0x14   :  { %342 = vmatprep.subr.bf16.mxu0 %v386_v10  ;;  %365 = vmatprep.subr.bf16.mxu1 %v386_v10 }
  0x17   :  { %343 = vmatpush3.bf16.msra.mxu0 %v387_v13  ;;  %373 = vmatpush3.bf16.msra.mxu1 %v387_v13 }
  0x18   :  { %344 = vmatprep.subr.bf16.mxu0 %v388_v14  ;;  %366 = vmatprep.subr.bf16.mxu1 %v388_v14 }
  0x1b   :  { %345 = vmatpush3.bf16.msra.mxu0 %v389_v15  ;;  %374 = vmatpush3.bf16.msra.mxu1 %v389_v15 }
  0x1c   :  { %346 = vmatprep.subr.bf16.mxu0 %v390_v16  ;;  %367 = vmatprep.subr.bf16.mxu1 %v390_v16 }
  0x1f   :  { %347 = vmatpush3.bf16.msra.mxu0 %v391_v17  ;;  %375 = vmatpush3.bf16.msra.mxu1 %v391_v17 }
  0x22   :  { %207 = vmatmul.mubr.bf16.vlgmr.msra.gmra.mrb[0].mxu0 %v392_v18  ;;  %215 = vmatmul.mubr.bf16.vlgmr.msra.gmra.mrb[0].mxu1 %v395_v19 }
  0xf5   :  { %v348_v20 = vpop.f32.mrb[0].mxu0  ;;  %v354_v21 = vpop.f32.mrb[0].mxu1 }
  0xf6   :  { %v349_v23 = vpop.f32.mrb[1].mxu0  ;;  %v355_v24 = vpop.f32.mrb[1].mxu1 }
  0xf7   :  { %v350_v25 = vadd.f32 %v349_v23, %v348_v20  ;;  %v351_v26 = vpop.f32.mrb[2].mxu0  ;;  %v356_v27 = vadd.f32 %v355_v24, %v354_v21  ;;  %v357_v28 = vpop.f32.mrb[2].mxu1 }
  0xf8   :  { %v352_v29 = vpop.f32.mrb[3].mxu0  ;;  %v358_v30 = vpop.f32.mrb[3].mxu1 }
  0xf9   :  { %v209_v31 = vadd.f32 %v350_v25, %v303_v22  ;;  %v217_v32 = vadd.f32 %v356_v27, %v303_v22  ;;  %v353_v33 = vadd.f32 %v352_v29, %v351_v26  ;;  %v359_v34 = vadd.f32 %v358_v30, %v357_v28 }
  0xfb   :  { %v212_v35 = vadd.f32 %v353_v33, %v303_v22  ;;  %v224_v36 = vsel %vm223_vm0, %v209_v31, 0.0  ;;  %v227_v37 = vsel %vm223_vm0, %v217_v32, 0.0  ;;  %v220_v39 = vadd.f32 %v359_v34, %v303_v22 }
  0xfd   :  { %v225_v38 = vsel %vm223_vm0, %v212_v35, 0.0  ;;  %v229_v42 = vsel %vm223_vm0, %v220_v39, 0.0 }
  0xfe   :  { %v226_v40 = vadd.f32 %v225_v38, %v224_v36 }
 0x100   :  { %v228_v41 = vadd.f32 %v227_v37, %v226_v40 }
 0x102   :  { %v230_v43 = vadd.f32 %v229_v42, %v228_v41 }
 0x104   :  { %v231_v44 = vrot.slane %v230_v43, 4 }
 0x106   :  { %v232_v45 = vadd.f32 %v231_v44, %v230_v43 }
 0x108   :  { %v233_v46 = vrot.slane %v232_v45, 2 }
 0x10a   :  { %v234_v47 = vadd.f32 %v233_v46, %v232_v45 }
 0x10c   :  { %v235_v48 = vrot.slane %v234_v47, 1 }
 0x10e   :  { %v236_v49 = vadd.f32 %v235_v48, %v234_v47 }
 0x110   :  { %v237_v50 = vmul.f32 0.03125, %v236_v49 }
 0x112   :  { %v238_v51 = vsub.f32 %v209_v31, %v237_v50  ;;  %v239_v52 = vsub.f32 %v212_v35, %v237_v50  ;;  %v240_v53 = vsub.f32 %v217_v32, %v237_v50  ;;  %v241_v54 = vsub.f32 %v220_v39, %v237_v50 }
 0x114   :  { %v242_v55 = vmul.f32 %v238_v51, %v238_v51  ;;  %v243_v56 = vmul.f32 %v239_v52, %v239_v52  ;;  %v244_v57 = vmul.f32 %v240_v53, %v240_v53  ;;  %v245_v58 = vmul.f32 %v241_v54, %v241_v54 }
 0x116   :  { %v246_v59 = vsel %vm223_vm0, %v242_v55, 0.0  ;;  %v247_v60 = vsel %vm223_vm0, %v243_v56, 0.0  ;;  %v249_v62 = vsel %vm223_vm0, %v244_v57, 0.0  ;;  %v251_v0 = vsel %vm223_vm0, %v245_v58, 0.0 }
 0x117   :  { %v248_v61 = vadd.f32 %v247_v60, %v246_v59 }
 0x119   :  { %v250_v63 = vadd.f32 %v249_v62, %v248_v61 }
 0x11b   :  { %v252_v1 = vadd.f32 %v251_v0, %v250_v63 }
 0x11d   :  { %v253_v2 = vrot.slane %v252_v1, 4 }
 0x11f   :  { %v254_v3 = vadd.f32 %v253_v2, %v252_v1 }
 0x121   :  { %v255_v4 = vrot.slane %v254_v3, 2 }
 0x123   :  { %v256_v5 = vadd.f32 %v255_v4, %v254_v3 }
 0x125   :  { %v257_v6 = vrot.slane %v256_v5, 1 }
 0x127   :  { %v258_v7 = vadd.f32 %v257_v6, %v256_v5 }
 0x129   :  { %v259_v8 = vmul.f32 0.03125, %v258_v7 }
 0x12b   :  { %v260_v9 = vadd.f32 1e-05, %v259_v8 }
 0x12d   :  { %398 = vrsqrt.f32 %v260_v9 }
 0x137   :  { %v399_v10 = vpop.eup %398 }
 0x138   :  { %v262_v11 = vmul.f32 %v399_v10, %v238_v51  ;;  %v263_v12 = vmul.f32 %v399_v10, %v239_v52  ;;  %v264_v13 = vmul.f32 %v399_v10, %v240_v53  ;;  %v265_v14 = vmul.f32 %v399_v10, %v241_v54 }
 0x13a   :  { %vm266_vm1 = vcmp.ge.f32.partialorder %v262_v11, 0.0  ;;  %vm267_vm2 = vcmp.ge.f32.partialorder %v263_v12, 0.0  ;;  %vm268_vm3 = vcmp.ge.f32.partialorder %v264_v13, 0.0  ;;  %vm269_vm4 = vcmp.ge.f32.partialorder %v265_v14, 0.0 }
 0x13b   :  { %v270_v15 = vmul.f32 0.2, %v262_v11  ;;  %v271_v16 = vmul.f32 0.2, %v263_v12  ;;  %v272_v17 = vmul.f32 0.2, %v264_v13 }
 0x13c   :  { %v273_v18 = vmul.f32 0.2, %v265_v14 }
 0x13d   :  { %v274_v19 = vsel %vm266_vm1, %v262_v11, %v270_v15  ;;  %v275_v20 = vsel %vm267_vm2, %v263_v12, %v271_v16  ;;  %v276_v21 = vsel %vm268_vm3, %v264_v13, %v272_v17 }
 0x13e   :  { %v277_v22 = vsel %vm269_vm4, %v265_v14, %v273_v18  ;;  %v328_v23 = vpack.c.bf16 %v274_v19, %v274_v19  ;;  %v329_v24 = vpack.c.bf16 %v275_v20, %v275_v20  ;;  %v330_v25 = vpack.c.bf16 %v276_v21, %v276_v21 }
 0x13f   :  { %v331_v26 = vpack.c.bf16 %v277_v22, %v277_v22 }
 0x140   :  { %295 = vst.msk [vmem:[%s506_s3] sm:$0xf] %vm294_vm5, %v328_v23  ;;  %296 = vst.msk [vmem:[%s506_s3 + $0x4] sm:$0xf] %vm294_vm5, %v329_v24 }
 0x141   :  { %297 = vst.msk [vmem:[%s506_s3 + $0x8] sm:$0xf] %vm294_vm5, %v330_v25  ;;  %298 = vst.msk [vmem:[%s506_s3 + $0xc] sm:$0xf] %vm294_vm5, %v331_v26 }

// kernel: patchgan_forward.8
= control target key start
LH: loop header
LB: loop body
LE: loop exit
PB: predicated region body
PF: predicated region fallthrough
CT: control target
= control target key end

     0   :  { %vm414_vm0 = vcmask 523264   ;;  %vm418_vm1 = vcmask 517120   ;;  %vm473_vm5 = vcmask 519168   ;;  %vm476_vm6 = vcmask 516096   ;;  %s781_s1 = inlined_call_operand.vmem [shape: bf16[512,64], index: 1, kind: input, shape index: {}]   ;;  %s782_s0 = inlined_call_operand.vmem [shape: bf16[18,512], index: 0, kind: input, shape index: {}]   ;;  %s783_s2 = inlined_call_operand.vmem [shape: f32[1,64], index: 2, kind: input, shape index: {}]   ;;  %s784_s3 = inlined_call_operand.vmem [shape: bf16[18,64], index: 3, kind: output, shape index: {}]  }
   0x1   :  { %v585_v0 = vld [vmem:[%s781_s1 + $0x40] sm:$0xff]   ;;  %v589_v4 = vld [vmem:[%s781_s1 + $0x48] sm:$0xff]   ;;  %v593_v8 = vld [vmem:[%s781_s1 + $0x50] sm:$0xff]  }
   0x2   :  { %v586_v1 = vld [vmem:[%s781_s1 + $0xc0] sm:$0xff]   ;;  %529 = vmatprep.subr.bf16.mxu0 %v585_v0  ;;  %v590_v5 = vld [vmem:[%s781_s1 + $0xc8] sm:$0xff]   ;;  %v594_v9 = vld [vmem:[%s781_s1 + $0xd0] sm:$0xff]  }
   0x3   :  { %v587_v2 = vld [vmem:[%s781_s1] sm:$0xff]   ;;  %557 = vmatprep.subr.bf16.mxu1 %v586_v1  ;;  %v591_v6 = vld [vmem:[%s781_s1 + $0x8] sm:$0xff]   ;;  %v595_v10 = vld [vmem:[%s781_s1 + $0x10] sm:$0xff]  }
   0x4   :  { %v588_v3 = vld [vmem:[%s781_s1 + $0x80] sm:$0xff]   ;;  %530 = vmatpush3.bf16.msra.mxu0 %v587_v2  ;;  %v592_v7 = vld [vmem:[%s781_s1 + $0x88] sm:$0xff]   ;;  %v596_v11 = vld [vmem:[%s781_s1 + $0x90] sm:$0xff]  }
   0x5   :  { %558 = vmatpush3.bf16.msra.mxu1 %v588_v3  ;;  %531 = vmatprep.subr.bf16.mxu0 %v589_v4  ;;  %v597_v12 = vld [vmem:[%s781_s1 + $0x58] sm:$0xff]   ;;  %v601_v16 = vld [vmem:[%s781_s1 + $0x60] sm:$0xff]   ;;  %v605_v20 = vld [vmem:[%s781_s1 + $0x68] sm:$0xff]  }
   0x6   :  { %559 = vmatprep.subr.bf16.mxu1 %v590_v5  ;;  %v598_v13 = vld [vmem:[%s781_s1 + $0xd8] sm:$0xff]   ;;  %v602_v17 = vld [vmem:[%s781_s1 + $0xe0] sm:$0xff]   ;;  %v606_v21 = vld [vmem:[%s781_s1 + $0xe8] sm:$0xff]  }
   0x7   :  { %v599_v14 = vld [vmem:[%s781_s1 + $0x18] sm:$0xff]   ;;  %v603_v18 = vld [vmem:[%s781_s1 + $0x20] sm:$0xff]   ;;  %v607_v22 = vld [vmem:[%s781_s1 + $0x28] sm:$0xff]  }
   0x8   :  { %532 = vmatpush3.bf16.msra.mxu0 %v591_v6  ;;  %v600_v15 = vld [vmem:[%s781_s1 + $0x98] sm:$0xff]   ;;  %v604_v19 = vld [vmem:[%s781_s1 + $0xa0] sm:$0xff]   ;;  %v608_v23 = vld [vmem:[%s781_s1 + $0xa8] sm:$0xff]  }
   0x9   :  { %560 = vmatpush3.bf16.msra.mxu1 %v592_v7  ;;  %533 = vmatprep.subr.bf16.mxu0 %v593_v8  ;;  %v609_v24 = vld [vmem:[%s781_s1 + $0x70] sm:$0xff]   ;;  %v613_v28 = vld [vmem:[%s781_s1 + $0x78] sm:$0xff]   ;;  %v19_v36 = vld [vmem:[%s782_s0 + $0x20] sm:$0x11] }
   0xa   :  { %561 = vmatprep.subr.bf16.mxu1 %v594_v9  ;;  %v610_v25 = vld [vmem:[%s781_s1 + $0xf0] sm:$0xff]   ;;  %v614_v29 = vld [vmem:[%s781_s1 + $0xf8] sm:$0xff]   ;;  %v488_v37 = vcombine.high %v19_v36, %v19_v36  ;;  %v20_v38 = vld [vmem:[%s782_s0 + $0x28] sm:$0x11]  ;;  %v487_v40 = vcombine.low %v19_v36, %v19_v36 }
   0xb   :  { %v611_v26 = vld [vmem:[%s781_s1 + $0x30] sm:$0xff]   ;;  %v615_v30 = vld [vmem:[%s781_s1 + $0x38] sm:$0xff]   ;;  %v490_v39 = vcombine.high %v20_v38, %v20_v38  ;;  %v489_v41 = vcombine.low %v20_v38, %v20_v38  ;;  %v482_v44 = vld [vmem:[%s783_s2] ss:$0 sm:$0xff] }
   0xc   :  { %534 = vmatpush3.bf16.msra.mxu0 %v595_v10  ;;  %v612_v27 = vld [vmem:[%s781_s1 + $0xb0] sm:$0xff]   ;;  %v616_v31 = vld [vmem:[%s781_s1 + $0xb8] sm:$0xff]  }
   0xd   :  { %562 = vmatpush3.bf16.msra.mxu1 %v596_v11  ;;  %535 = vmatprep.subr.bf16.mxu0 %v597_v12  ;;  %v617_v32 = vld [vmem:[%s782_s0] ss:$16 sps:$4 sm:$0xff]   ;;  %v619_v33 = vld [vmem:[%s782_s0 + $0x4] ss:$16 sps:$4 sm:$0xff]   ;;  %v620_v34 = vld [vmem:[%s782_s0 + $0x8] ss:$16 sps:$4 sm:$0xff]  }
   0xe   :  { %563 = vmatprep.subr.bf16.mxu1 %v598_v13  ;;  %v622_v35 = vld [vmem:[%s782_s0 + $0xc] ss:$16 sps:$4 sm:$0xff]   ;;  %350 = vmatprep.mubr.bf16.mxu0 %v619_v33 }
   0xf   :  { %398 = vmatprep.mubr.bf16.mxu1 %v622_v35 }
  0x10   :  { %536 = vmatpush3.bf16.msra.mxu0 %v599_v14 }
  0x11   :  { %564 = vmatpush3.bf16.msra.mxu1 %v600_v15  ;;  %537 = vmatprep.subr.bf16.mxu0 %v601_v16 }
  0x12   :  { %565 = vmatprep.subr.bf16.mxu1 %v602_v17 }
  0x14   :  { %538 = vmatpush3.bf16.msra.mxu0 %v603_v18 }
  0x15   :  { %566 = vmatpush3.bf16.msra.mxu1 %v604_v19  ;;  %539 = vmatprep.subr.bf16.mxu0 %v605_v20 }
  0x16   :  { %567 = vmatprep.subr.bf16.mxu1 %v606_v21 }
  0x18   :  { %540 = vmatpush3.bf16.msra.mxu0 %v607_v22 }
  0x19   :  { %568 = vmatpush3.bf16.msra.mxu1 %v608_v23  ;;  %541 = vmatprep.subr.bf16.mxu0 %v609_v24 }
  0x1a   :  { %569 = vmatprep.subr.bf16.mxu1 %v610_v25 }
  0x1c   :  { %542 = vmatpush3.bf16.msra.mxu0 %v611_v26 }
  0x1d   :  { %570 = vmatpush3.bf16.msra.mxu1 %v612_v27  ;;  %543 = vmatprep.subr.bf16.mxu0 %v613_v28 }
  0x1e   :  { %571 = vmatprep.subr.bf16.mxu1 %v614_v29 }
  0x20   :  { %544 = vmatpush3.bf16.msra.mxu0 %v615_v30 }
  0x21   :  { %572 = vmatpush3.bf16.msra.mxu1 %v616_v31 }
  0x23   :  { %351 = vmatmul.mubr.bf16.vlgmr.msra.gmra.mrb[0].mxu0 %v617_v32 }
  0x24   :  { %399 = vmatmul.mubr.bf16.vlgmr.msra.gmra.mrb[0].mxu1 %v620_v34  ;;  %358 = vmatprep.mubr.bf16.mxu0 %v488_v37 }
  0x25   :  { %406 = vmatprep.mubr.bf16.mxu1 %v490_v39 }
  0x2b   :  { %359 = vmatmul.mubr.bf16.gmra.mrb[4].mxu0 %v487_v40 }
  0x2c   :  { %407 = vmatmul.mubr.bf16.gmra.mrb[4].mxu1 %v489_v41 }
  0xf6   :  { %v545_v42 = vpop.f32.mrb[0].mxu0 }
  0xf7   :  { %v573_v43 = vpop.f32.mrb[0].mxu1  ;;  %v546_v45 = vpop.f32.mrb[1].mxu0 }
  0xf8   :  { %v547_v46 = vadd.f32 %v546_v45, %v545_v42  ;;  %v574_v47 = vpop.f32.mrb[1].mxu1  ;;  %v548_v48 = vpop.f32.mrb[2].mxu0 }
  0xf9   :  { %v575_v49 = vadd.f32 %v574_v47, %v573_v43  ;;  %v576_v50 = vpop.f32.mrb[2].mxu1  ;;  %v549_v51 = vpop.f32.mrb[3].mxu0 }
  0xfa   :  { %v353_v52 = vadd.f32 %v547_v46, %v482_v44  ;;  %v550_v53 = vadd.f32 %v549_v51, %v548_v48  ;;  %v577_v54 = vpop.f32.mrb[3].mxu1 }
  0xfb   :  { %v578_v55 = vadd.f32 %v577_v54, %v576_v50 }
  0xfc   :  { %v401_v56 = vadd.f32 %v575_v49, %v353_v52  ;;  %v356_v57 = vadd.f32 %v550_v53, %v482_v44 }
  0xfe   :  { %v404_v58 = vadd.f32 %v578_v55, %v356_v57  ;;  %v551_v59 = vpop.f32.mrb[4].mxu0  ;;  %v415_v62 = vsel %vm414_vm0, %v401_v56, 0.0 }
  0xff   :  { %v579_v60 = vpop.f32.mrb[4].mxu1  ;;  %v552_v61 = vpop.f32.mrb[5].mxu0 }
 0x100   :  { %v416_v63 = vsel %vm414_vm0, %v404_v58, 0.0  ;;  %v553_v0 = vadd.f32 %v552_v61, %v551_v59  ;;  %v580_v1 = vpop.f32.mrb[5].mxu1  ;;  %v554_v2 = vpop.f32.mrb[6].mxu0 }
 0x101   :  { %v417_v3 = vadd.f32 %v416_v63, %v415_v62  ;;  %v581_v4 = vadd.f32 %v580_v1, %v579_v60  ;;  %v582_v5 = vpop.f32.mrb[6].mxu1  ;;  %v555_v6 = vpop.f32.mrb[7].mxu0 }
 0x102   :  { %v361_v7 = vadd.f32 %v553_v0, %v482_v44  ;;  %v583_v8 = vpop.f32.mrb[7].mxu1 }
 0x104   :  { %v409_v9 = vadd.f32 %v581_v4, %v361_v7 }
 0x106   :  { %v419_v10 = vsel %vm418_vm1, %v409_v9, 0.0 }
 0x107   :  { %v420_v11 = vadd.f32 %v419_v10, %v417_v3 }
 0x109   :  { %v421_v12 = vrot.slane %v420_v11, 4 }
 0x10b   :  { %v422_v13 = vadd.f32 %v421_v12, %v420_v11 }
 0x10d   :  { %v423_v14 = vrot.slane %v422_v13, 2 }
 0x10f   :  { %v424_v15 = vadd.f32 %v423_v14, %v422_v13 }
 0x111   :  { %v425_v16 = vrot.slane %v424_v15, 1 }
 0x113   :  { %v426_v17 = vadd.f32 %v425_v16, %v424_v15 }
 0x115   :  { %v427_v18 = vmul.f32 0.055555556, %v426_v17 }
 0x117   :  { %v428_v19 = vsub.f32 %v401_v56, %v427_v18  ;;  %v429_v20 = vsub.f32 %v404_v58, %v427_v18  ;;  %v430_v21 = vsub.f32 %v409_v9, %v427_v18 }
 0x119   :  { %v431_v22 = vmul.f32 %v428_v19, %v428_v19  ;;  %v432_v23 = vmul.f32 %v429_v20, %v429_v20  ;;  %v433_v24 = vmul.f32 %v430_v21, %v430_v21 }
 0x11b   :  { %v434_v25 = vsel %vm414_vm0, %v431_v22, 0.0  ;;  %v435_v26 = vsel %vm414_vm0, %v432_v23, 0.0  ;;  %v437_v28 = vsel %vm418_vm1, %v433_v24, 0.0 }
 0x11c   :  { %v436_v27 = vadd.f32 %v435_v26, %v434_v25 }
 0x11e   :  { %v438_v29 = vadd.f32 %v437_v28, %v436_v27 }
 0x120   :  { %v439_v30 = vrot.slane %v438_v29, 4 }
 0x122   :  { %v440_v31 = vadd.f32 %v439_v30, %v438_v29 }
 0x124   :  { %v441_v32 = vrot.slane %v440_v31, 2 }
 0x126   :  { %v442_v33 = vadd.f32 %v441_v32, %v440_v31 }
 0x128   :  { %v443_v34 = vrot.slane %v442_v33, 1 }
 0x12a   :  { %v444_v35 = vadd.f32 %v443_v34, %v442_v33 }
 0x12c   :  { %v445_v36 = vmul.f32 0.055555556, %v444_v35 }
 0x12e   :  { %v446_v37 = vadd.f32 1e-05, %v445_v36 }
 0x130   :  { %627 = vrsqrt.f32 %v446_v37 }
 0x13a   :  { %v628_v38 = vpop.eup %627 }
 0x13b   :  { %v448_v39 = vmul.f32 %v628_v38, %v428_v19  ;;  %v449_v40 = vmul.f32 %v628_v38, %v429_v20  ;;  %v450_v41 = vmul.f32 %v628_v38, %v430_v21 }
 0x13d   :  { %vm451_vm2 = vcmp.ge.f32.partialorder %v448_v39, 0.0  ;;  %vm452_vm3 = vcmp.ge.f32.partialorder %v449_v40, 0.0  ;;  %vm453_vm4 = vcmp.ge.f32.partialorder %v450_v41, 0.0  ;;  %v454_v42 = vmul.f32 0.2, %v448_v39 }
 0x13e   :  { %v455_v43 = vmul.f32 0.2, %v449_v40  ;;  %v456_v44 = vmul.f32 0.2, %v450_v41 }
 0x13f   :  { %v457_v45 = vsel %vm451_vm2, %v448_v39, %v454_v42 }
 0x140   :  { %v458_v46 = vsel %vm452_vm3, %v449_v40, %v455_v43  ;;  %v459_v47 = vsel %vm453_vm4, %v450_v41, %v456_v44  ;;  %v526_v48 = vpack.c.bf16 %v457_v45, %v457_v45 }
 0x141   :  { %v527_v49 = vpack.c.bf16 %v458_v46, %v458_v46  ;;  %v528_v50 = vpack.c.bf16 %v459_v47, %v459_v47 }
 0x142   :  { %474 = vst.msk [vmem:[%s784_s3] sm:$0xf] %vm473_vm5, %v526_v48 }
 0x143   :  { %475 = vst.msk [vmem:[%s784_s3 + $0x4] sm:$0xf] %vm473_vm5, %v527_v49 }
 0x144   :  { %477 = vst.msk [vmem:[%s784_s3 + $0x8] sm:$0x1] %vm476_vm6, %v528_v50 }

// kernel: patchgan_forward.9
= control target key start
LH: loop header
LB: loop body
LE: loop exit
PB: predicated region body
PF: predicated region fallthrough
CT: control target
= control target key end

     0   :  { %vm728_vm0 = vcmask 7168   ;;  %s1197_s1 = inlined_call_operand.vmem [shape: bf16[1024,1], index: 1, kind: input, shape index: {}]   ;;  %s1198_s0 = inlined_call_operand.vmem [shape: bf16[8,1024], index: 0, kind: input, shape index: {}]   ;;  %s1199_s2 = inlined_call_operand.<no memory space> [shape: f32[1,1], index: 2, kind: input, shape index: {}]   ;;  %s1200_s3 = inlined_call_operand.vmem [shape: f32[8,1], index: 3, kind: output, shape index: {}]  }
   0x1   :  { %v895_v0 = vld [vmem:[%s1197_s1 + $0x40] sm:$0xff]   ;;  %v899_v4 = vld [vmem:[%s1197_s1 + $0x48] sm:$0xff]   ;;  %v903_v8 = vld [vmem:[%s1197_s1 + $0x50] sm:$0xff]  }
   0x2   :  { %v896_v1 = vld [vmem:[%s1197_s1 + $0xc0] sm:$0xff]   ;;  %807 = vmatprep.subr.bf16.mxu0 %v895_v0  ;;  %v900_v5 = vld [vmem:[%s1197_s1 + $0xc8] sm:$0xff]   ;;  %v904_v9 = vld [vmem:[%s1197_s1 + $0xd0] sm:$0xff]  }
   0x3   :  { %v897_v2 = vld [vmem:[%s1197_s1] sm:$0xff]   ;;  %829 = vmatprep.subr.bf16.mxu1 %v896_v1  ;;  %v901_v6 = vld [vmem:[%s1197_s1 + $0x8] sm:$0xff]   ;;  %v905_v10 = vld [vmem:[%s1197_s1 + $0x10] sm:$0xff]  }
   0x4   :  { %v898_v3 = vld [vmem:[%s1197_s1 + $0x80] sm:$0xff]   ;;  %808 = vmatpush3.bf16.msra.mxu0 %v897_v2  ;;  %v902_v7 = vld [vmem:[%s1197_s1 + $0x88] sm:$0xff]   ;;  %v906_v11 = vld [vmem:[%s1197_s1 + $0x90] sm:$0xff]  }
   0x5   :  { %830 = vmatpush3.bf16.msra.mxu1 %v898_v3  ;;  %809 = vmatprep.subr.bf16.mxu0 %v899_v4  ;;  %v907_v12 = vld [vmem:[%s1197_s1 + $0x58] sm:$0xff]   ;;  %v911_v16 = vld [vmem:[%s1197_s1 + $0x60] sm:$0xff]   ;;  %v915_v20 = vld [vmem:[%s1197_s1 + $0x68] sm:$0xff]  }
   0x6   :  { %831 = vmatprep.subr.bf16.mxu1 %v900_v5  ;;  %v908_v13 = vld [vmem:[%s1197_s1 + $0xd8] sm:$0xff]   ;;  %v912_v17 = vld [vmem:[%s1197_s1 + $0xe0] sm:$0xff]   ;;  %v916_v21 = vld [vmem:[%s1197_s1 + $0xe8] sm:$0xff]  }
   0x7   :  { %v909_v14 = vld [vmem:[%s1197_s1 + $0x18] sm:$0xff]   ;;  %v913_v18 = vld [vmem:[%s1197_s1 + $0x20] sm:$0xff]   ;;  %v917_v22 = vld [vmem:[%s1197_s1 + $0x28] sm:$0xff]  }
   0x8   :  { %810 = vmatpush3.bf16.msra.mxu0 %v901_v6  ;;  %v910_v15 = vld [vmem:[%s1197_s1 + $0x98] sm:$0xff]   ;;  %v914_v19 = vld [vmem:[%s1197_s1 + $0xa0] sm:$0xff]   ;;  %v918_v23 = vld [vmem:[%s1197_s1 + $0xa8] sm:$0xff]  }
   0x9   :  { %832 = vmatpush3.bf16.msra.mxu1 %v902_v7  ;;  %811 = vmatprep.subr.bf16.mxu0 %v903_v8  ;;  %v919_v24 = vld [vmem:[%s1197_s1 + $0x70] sm:$0xff]   ;;  %v923_v28 = vld [vmem:[%s1197_s1 + $0x78] sm:$0xff]   ;;  %v17_v32 = vld [vmem:[%s1198_s0] sm:$0xff] }
   0xa   :  { %833 = vmatprep.subr.bf16.mxu1 %v904_v9  ;;  %v920_v25 = vld [vmem:[%s1197_s1 + $0xf0] sm:$0xff]   ;;  %v924_v29 = vld [vmem:[%s1197_s1 + $0xf8] sm:$0xff]   ;;  %v18_v33 = vld [vmem:[%s1198_s0 + $0x8] sm:$0xff]  ;;  %v735_v34 = vcombine.low %v17_v32, %v17_v32  ;;  %v736_v35 = vcombine.high %v17_v32, %v17_v32 }
   0xb   :  { %v921_v26 = vld [vmem:[%s1197_s1 + $0x30] sm:$0xff]   ;;  %v925_v30 = vld [vmem:[%s1197_s1 + $0x38] sm:$0xff]   ;;  %v737_v36 = vcombine.low %v18_v33, %v18_v33  ;;  %v738_v37 = vcombine.high %v18_v33, %v18_v33  ;;  %v931_v38 = vld [vmem:[%s1197_s1 + $0x140] sm:$0xff]  }
   0xc   :  { %812 = vmatpush3.bf16.msra.mxu0 %v905_v10  ;;  %v922_v27 = vld [vmem:[%s1197_s1 + $0xb0] sm:$0xff]   ;;  %v926_v31 = vld [vmem:[%s1197_s1 + $0xb8] sm:$0xff]   ;;  %v932_v39 = vld [vmem:[%s1197_s1 + $0x1c0] sm:$0xff]   ;;  %600 = vmatprep.mubr.bf16.mxu0 %v736_v35 }
   0xd   :  { %834 = vmatpush3.bf16.msra.mxu1 %v906_v11  ;;  %813 = vmatprep.subr.bf16.mxu0 %v907_v12  ;;  %v933_v40 = vld [vmem:[%s1197_s1 + $0x100] sm:$0xff]   ;;  %v935_v42 = vld [vmem:[%s1197_s1 + $0x148] sm:$0xff]   ;;  %v939_v46 = vld [vmem:[%s1197_s1 + $0x150] sm:$0xff]   ;;  %v8_v12 = vstv %s1199_s2 }
   0xe   :  { %835 = vmatprep.subr.bf16.mxu1 %v908_v13  ;;  %640 = vmatprep.mubr.bf16.mxu1 %v738_v37  ;;  %v934_v41 = vld [vmem:[%s1197_s1 + $0x180] sm:$0xff]   ;;  %v936_v43 = vld [vmem:[%s1197_s1 + $0x1c8] sm:$0xff]   ;;  %v940_v47 = vld [vmem:[%s1197_s1 + $0x1d0] sm:$0xff]   ;;  %9 = vst [vmem:[#allocation2] sm:$0x1] %v8_v12 }
   0xf   :  { %v937_v44 = vld [vmem:[%s1197_s1 + $0x108] sm:$0xff]   ;;  %v941_v48 = vld [vmem:[%s1197_s1 + $0x110] sm:$0xff]   ;;  %v943_v50 = vld [vmem:[%s1197_s1 + $0x158] sm:$0xff]  }
  0x10   :  { %814 = vmatpush3.bf16.msra.mxu0 %v909_v14  ;;  %v938_v45 = vld [vmem:[%s1197_s1 + $0x188] sm:$0xff]   ;;  %v942_v49 = vld [vmem:[%s1197_s1 + $0x190] sm:$0xff]   ;;  %v944_v51 = vld [vmem:[%s1197_s1 + $0x1d8] sm:$0xff]  }
  0x11   :  { %836 = vmatpush3.bf16.msra.mxu1 %v910_v15  ;;  %815 = vmatprep.subr.bf16.mxu0 %v911_v16  ;;  %v945_v52 = vld [vmem:[%s1197_s1 + $0x118] sm:$0xff]   ;;  %v947_v54 = vld [vmem:[%s1197_s1 + $0x160] sm:$0xff]   ;;  %v951_v58 = vld [vmem:[%s1197_s1 + $0x168] sm:$0xff]  }
  0x12   :  { %837 = vmatprep.subr.bf16.mxu1 %v912_v17  ;;  %v946_v53 = vld [vmem:[%s1197_s1 + $0x198] sm:$0xff]   ;;  %v948_v55 = vld [vmem:[%s1197_s1 + $0x1e0] sm:$0xff]   ;;  %v952_v59 = vld [vmem:[%s1197_s1 + $0x1e8] sm:$0xff]  }
  0x13   :  { %v949_v56 = vld [vmem:[%s1197_s1 + $0x120] sm:$0xff]   ;;  %v953_v60 = vld [vmem:[%s1197_s1 + $0x128] sm:$0xff]   ;;  %v955_v62 = vld [vmem:[%s1197_s1 + $0x170] sm:$0xff]  }
  0x14   :  { %816 = vmatpush3.bf16.msra.mxu0 %v913_v18  ;;  %v950_v57 = vld [vmem:[%s1197_s1 + $0x1a0] sm:$0xff]   ;;  %v954_v61 = vld [vmem:[%s1197_s1 + $0x1a8] sm:$0xff]   ;;  %v956_v63 = vld [vmem:[%s1197_s1 + $0x1f0] sm:$0xff]  }
  0x15   :  { %838 = vmatpush3.bf16.msra.mxu1 %v914_v19  ;;  %817 = vmatprep.subr.bf16.mxu0 %v915_v20  ;;  %v957_v0 = vld [vmem:[%s1197_s1 + $0x130] sm:$0xff]   ;;  %v959_v2 = vld [vmem:[%s1197_s1 + $0x178] sm:$0xff]   ;;  %v734_v15 = vld [vmem:[#allocation2] ss:$0 sm:$0xff] }
  0x16   :  { %839 = vmatprep.subr.bf16.mxu1 %v916_v21  ;;  %v958_v1 = vld [vmem:[%s1197_s1 + $0x1b0] sm:$0xff]   ;;  %v960_v3 = vld [vmem:[%s1197_s1 + $0x1f8] sm:$0xff]  }
  0x17   :  { %v961_v4 = vld [vmem:[%s1197_s1 + $0x138] sm:$0xff]   ;;  %v19_v6 = vld [vmem:[%s1198_s0 + $0x10] sm:$0xff] }
  0x18   :  { %818 = vmatpush3.bf16.msra.mxu0 %v917_v22  ;;  %v962_v5 = vld [vmem:[%s1197_s1 + $0x1b8] sm:$0xff]   ;;  %v739_v7 = vcombine.low %v19_v6, %v19_v6  ;;  %v740_v8 = vcombine.high %v19_v6, %v19_v6 }
  0x19   :  { %840 = vmatpush3.bf16.msra.mxu1 %v918_v23  ;;  %819 = vmatprep.subr.bf16.mxu0 %v919_v24  ;;  %v20_v9 = vld [vmem:[%s1198_s0 + $0x18] sm:$0xff] }
  0x1a   :  { %841 = vmatprep.subr.bf16.mxu1 %v920_v25  ;;  %v741_v10 = vcombine.low %v20_v9, %v20_v9  ;;  %v742_v11 = vcombine.high %v20_v9, %v20_v9 }
  0x1c   :  { %820 = vmatpush3.bf16.msra.mxu0 %v921_v26 }
  0x1d   :  { %842 = vmatpush3.bf16.msra.mxu1 %v922_v27  ;;  %821 = vmatprep.subr.bf16.mxu0 %v923_v28 }
  0x1e   :  { %843 = vmatprep.subr.bf16.mxu1 %v924_v29 }
  0x20   :  { %822 = vmatpush3.bf16.msra.mxu0 %v925_v30 }
  0x21   :  { %844 = vmatpush3.bf16.msra.mxu1 %v926_v31  ;;  %851 = vmatprep.subr.bf16.mxu0 %v931_v38 }
  0x22   :  { %873 = vmatprep.subr.bf16.mxu1 %v932_v39 }
  0x23   :  { %601 = vmatmul.mubr.bf16.vlgmr.msra.gmra.mrb[0].mxu0 %v735_v34 }
  0x24   :  { %641 = vmatmul.mubr.bf16.vlgmr.msra.gmra.mrb[0].mxu1 %v737_v36  ;;  %852 = vmatpush3.bf16.msra.mxu0 %v933_v40 }
  0x25   :  { %874 = vmatpush3.bf16.msra.mxu1 %v934_v41  ;;  %853 = vmatprep.subr.bf16.mxu0 %v935_v42 }
  0x26   :  { %875 = vmatprep.subr.bf16.mxu1 %v936_v43  ;;  %680 = vmatprep.mubr.bf16.mxu0 %v740_v8 }
  0x27   :  { %720 = vmatprep.mubr.bf16.mxu1 %v742_v11 }
  0x28   :  { %854 = vmatpush3.bf16.msra.mxu0 %v937_v44 }
  0x29   :  { %876 = vmatpush3.bf16.msra.mxu1 %v938_v45  ;;  %855 = vmatprep.subr.bf16.mxu0 %v939_v46 }
  0x2a   :  { %877 = vmatprep.subr.bf16.mxu1 %v940_v47 }
  0x2c   :  { %856 = vmatpush3.bf16.msra.mxu0 %v941_v48 }
  0x2d   :  { %878 = vmatpush3.bf16.msra.mxu1 %v942_v49  ;;  %857 = vmatprep.subr.bf16.mxu0 %v943_v50 }
  0x2e   :  { %879 = vmatprep.subr.bf16.mxu1 %v944_v51 }
  0x30   :  { %858 = vmatpush3.bf16.msra.mxu0 %v945_v52 }
  0x31   :  { %880 = vmatpush3.bf16.msra.mxu1 %v946_v53  ;;  %859 = vmatprep.subr.bf16.mxu0 %v947_v54 }
  0x32   :  { %881 = vmatprep.subr.bf16.mxu1 %v948_v55 }
  0x34   :  { %860 = vmatpush3.bf16.msra.mxu0 %v949_v56 }
  0x35   :  { %882 = vmatpush3.bf16.msra.mxu1 %v950_v57  ;;  %861 = vmatprep.subr.bf16.mxu0 %v951_v58 }
  0x36   :  { %883 = vmatprep.subr.bf16.mxu1 %v952_v59 }
  0x38   :  { %862 = vmatpush3.bf16.msra.mxu0 %v953_v60 }
  0x39   :  { %884 = vmatpush3.bf16.msra.mxu1 %v954_v61  ;;  %863 = vmatprep.subr.bf16.mxu0 %v955_v62 }
  0x3a   :  { %885 = vmatprep.subr.bf16.mxu1 %v956_v63 }
  0x3c   :  { %864 = vmatpush3.bf16.msra.mxu0 %v957_v0 }
  0x3d   :  { %886 = vmatpush3.bf16.msra.mxu1 %v958_v1  ;;  %865 = vmatprep.subr.bf16.mxu0 %v959_v2 }
  0x3e   :  { %887 = vmatprep.subr.bf16.mxu1 %v960_v3 }
  0x40   :  { %866 = vmatpush3.bf16.msra.mxu0 %v961_v4 }
  0x41   :  { %888 = vmatpush3.bf16.msra.mxu1 %v962_v5 }
  0x43   :  { %681 = vmatmul.mubr.bf16.vlgmr.msra.gmra.mrb[4].mxu0 %v739_v7 }
  0x44   :  { %721 = vmatmul.mubr.bf16.vlgmr.msra.gmra.mrb[4].mxu1 %v741_v10 }
  0xf6   :  { %v823_v13 = vpop.f32.mrb[0].mxu0 }
  0xf7   :  { %v845_v14 = vpop.f32.mrb[0].mxu1  ;;  %v824_v16 = vpop.f32.mrb[1].mxu0 }
  0xf8   :  { %v846_v17 = vpop.f32.mrb[1].mxu1  ;;  %v825_v18 = vadd.f32 %v824_v16, %v823_v13  ;;  %v826_v20 = vpop.f32.mrb[2].mxu0 }
  0xf9   :  { %v847_v19 = vadd.f32 %v846_v17, %v845_v14  ;;  %v848_v21 = vpop.f32.mrb[2].mxu1  ;;  %v827_v22 = vpop.f32.mrb[3].mxu0 }
  0xfa   :  { %v849_v23 = vpop.f32.mrb[3].mxu1  ;;  %v603_v24 = vadd.f32 %v825_v18, %v734_v15 }
  0xfc   :  { %v643_v25 = vadd.f32 %v847_v19, %v603_v24 }
 0x116   :  { %v867_v26 = vpop.f32.mrb[4].mxu0 }
 0x117   :  { %v889_v27 = vpop.f32.mrb[4].mxu1  ;;  %v868_v28 = vpop.f32.mrb[5].mxu0 }
 0x118   :  { %v890_v29 = vpop.f32.mrb[5].mxu1  ;;  %v869_v30 = vadd.f32 %v868_v28, %v867_v26  ;;  %v870_v32 = vpop.f32.mrb[6].mxu0 }
 0x119   :  { %v891_v31 = vadd.f32 %v890_v29, %v889_v27  ;;  %v892_v33 = vpop.f32.mrb[6].mxu1  ;;  %v871_v34 = vpop.f32.mrb[7].mxu0 }
 0x11a   :  { %v893_v35 = vpop.f32.mrb[7].mxu1  ;;  %v683_v36 = vadd.f32 %v869_v30, %v643_v25 }
 0x11c   :  { %v723_v37 = vadd.f32 %v891_v31, %v683_v36 }
 0x11e   :  { %729 = vst.msk [vmem:[%s1200_s3] sm:$0xff] %vm728_vm0, %v723_v37 }

</bundles_post_ra>
